<compile_context>
chip_gen: v7x
topology: tpu7x:2x2x1
jax: 0.10.0
libtpu: 0.0.40
codegen_flags: <defaults>
</compile_context>

<pallas_src>
import math

import jax
import jax.numpy as jnp
from jax.experimental import pallas as pl
from jax.experimental.pallas import tpu as pltpu


_HALF_LOG_2PI = 0.5 * math.log(2.0 * math.pi)


def _nf_kernel(x_ref, scale_ref, shift_ref, z_ref, lp_ref):
    """One batch tile.

    The K affine flows are pre-folded into a single affine map, so the flow
    stack is one fused multiply-add per element; the standard-Normal prior
    log-prob is reduced over the (lane-mapped) feature axis per row and
    written out as a lane-dense (1, tb) row.

    Ragged last tile: padded rows may contain arbitrary data, but every
    computation here is strictly per-row (no cross-row reduction), and Pallas
    masks out-of-range rows on writeback, so valid rows cannot be contaminated.
    """
    x = x_ref[...].astype(jnp.float32)                 # (TB, D)
    z = x * scale_ref[...] + shift_ref[...]            # (1, D) broadcast over rows
    z_ref[...] = z.astype(z_ref.dtype)

    d = x.shape[-1]
    # prior.log_prob(z).view(B, -1).sum(1) with prior = Normal(0, 1):
    #   -0.5 * sum(z^2) - D * 0.5*log(2*pi)   (constant added post-reduction)
    # NOTE: computed from the f32 z *before* any cast to z_ref.dtype; for the
    # bf16 I/O path this matches a reference that evaluates the prior on the
    # full-precision flow output (intentional).
    lp = -0.5 * jnp.sum(z * z, axis=-1) - d * _HALF_LOG_2PI   # (TB,)
    lp_ref[...] = lp[None, :]                                  # (1, TB) lane-dense


def _pick_tb(B, D, in_bytes):
    """Pick the batch tile size.

    Goals / constraints:
      * (tb, D) x/z blocks need tb % 8 == 0 and the lane-dense (1, tb)
        log-prob block needs tb % 128 == 0 (unless tb == B: a block equal to
        the full array is always legal).
      * >= 2 grid steps (ideally 4) whenever B > 256, so DMA overlaps compute
        and the batch axis can split across v7x's two TensorCores.
      * Never below 256 rows per tile (per-step overhead dominates below that).
      * Double-buffered blocks stay well under the 32 MiB scoped-VMEM default
        (v7x physical VMEM is only 64 MiB per TC).
    """
    if B <= 256:
        return B
    budget = 20 * 1024 * 1024
    per_row = 4 * D * in_bytes + 8          # x + z (double-buffered) + lp (f32)
    fixed = 4 * D * 4                       # scale + shift (double-buffered)
    vmem_cap = max(128, (budget - fixed) // per_row)
    tb = min(max(256, B // 4), vmem_cap, 2048)
    tb = (tb // 128) * 128
    if tb < 128 or tb >= B:
        return B
    return int(tb)


def normalizing_flow_forward(x, s, t, *, tb=None, core_parallel=False):
    """Equivalent of NormalizingFlow.forward(x, logDetJ=True).

    Args:
      x: (B, D) float32 or bfloat16 input.
      s: (K, D) log-scale parameters, one row per flow.
      t: (K, D) shift parameters, one row per flow.
      tb: optional batch tile size; rounded to a legal value if given.
      core_parallel: use pltpu.CORE_PARALLEL on the batch grid axis to force a
        per-TensorCore split on v7x (requires the grid to divide across cores);
        default is pltpu.PARALLEL which is safe on every generation.
    Returns:
      (z, log_det, prior_logprob) with shapes (B, D), (B,), (B,).
    """
    B, D = x.shape
    in_bytes = jnp.dtype(x.dtype).itemsize

    s32 = s.astype(jnp.float32)
    t32 = t.astype(jnp.float32)

    # Fold the K constant affine flows into ONE affine map (closed form):
    #   z = x * exp(S) + sum_k t_k * exp(S - cumsum(s)_k),   S = sum_k s_k
    # (folding exp(sum s) vs. sequential exp's changes rounding slightly; the
    #  test tolerances account for this -- intentional.)
    total = jnp.sum(s32, axis=0)                                        # (D,)
    scale = jnp.exp(total)[None, :]                                     # (1, D)
    shift = jnp.sum(
        t32 * jnp.exp(total[None, :] - jnp.cumsum(s32, axis=0)), axis=0
    )[None, :]                                                          # (1, D)

    # log|det J| of a stack of constant affine flows is identical for every
    # sample in the batch: sum over all s entries, broadcast over B.
    log_det = jnp.full((B,), jnp.sum(s32), dtype=jnp.float32)

    if tb is None:
        tb = _pick_tb(B, D, in_bytes)
    else:
        tb = min(int(tb), B)
        if tb < B:
            # Enforce the (8, 128) sublane/lane rules for the x/z and the
            # lane-dense lp blocks.
            tb = max(128, (tb // 128) * 128)
        if tb >= B:
            tb = B
    grid = (pl.cdiv(B, tb),)

    # VMEM actually used by the double-buffered pipeline (+ headroom).
    vmem_needed = (
        4 * tb * D * in_bytes   # x + z blocks, 2 pipeline buffers each
        + 2 * tb * 4            # (1, tb) log-prob block, 2 buffers
        + 4 * D * 4             # scale + shift (1, D) f32, 2 buffers each
    )
    vmem_limit = int(min(vmem_needed + (4 << 20), 48 << 20))

    sem = pltpu.CORE_PARALLEL if core_parallel else pltpu.PARALLEL

    z, lp = pl.pallas_call(
        _nf_kernel,
        out_shape=(
            jax.ShapeDtypeStruct((B, D), x.dtype),        # z
            jax.ShapeDtypeStruct((1, B), jnp.float32),    # prior_logprob (row)
        ),
        grid=grid,
        in_specs=[
            pl.BlockSpec((tb, D), lambda i: (i, 0)),   # x: batch-tiled, pipelined
            pl.BlockSpec((1, D), lambda i: (0, 0)),    # folded scale: VMEM-resident
            pl.BlockSpec((1, D), lambda i: (0, 0)),    # folded shift: VMEM-resident
        ],
        out_specs=(
            pl.BlockSpec((tb, D), lambda i: (i, 0)),   # z: lane-dense stores
            pl.BlockSpec((1, tb), lambda i: (0, i)),   # lp: lane-dense row stores
        ),
        compiler_params=pltpu.CompilerParams(
            dimension_semantics=(sem,),
            vmem_limit_bytes=vmem_limit,
        ),
    )(x, scale, shift)

    # TODO(synk): if z is immediately consumed downstream (e.g. a scalar NLL
    # from prior_logprob + log_det), fuse that consumer into this kernel / skip
    # the z writeback -- this kernel has zero MXU work and is purely the x-read
    # + z-write DMA, so that is the only remaining ~2x lever. The module's
    # inverse/sample/forward_intermediate host-side paths are not kernelized.
    return z, log_det, lp[0]


def _reference_forward(x, s, t):
    """Plain-JAX reference mirroring the PyTorch semantics (unfolded loop)."""
    z = x.astype(jnp.float32)
    log_det = jnp.zeros((x.shape[0],), jnp.float32)
    for k in range(s.shape[0]):
        z = z * jnp.exp(s[k][None, :]) + t[k][None, :]
        log_det = log_det + jnp.sum(s[k])
    lp = jnp.sum(-0.5 * z * z - 0.5 * jnp.log(2.0 * jnp.pi), axis=1)
    return z, log_det, lp


if __name__ == "__main__":
    B, D, K = 512, 256, 6   # batch, feature dim, number of flows

    key = jax.random.PRNGKey(0)
    kx, ks, kt = jax.random.split(key, 3)
    x = jax.random.normal(kx, (B, D), dtype=jnp.float32)
    # Deterministic small parameters (synthetic weights, no checkpoint load).
    s = 0.1 * jax.random.normal(ks, (K, D), dtype=jnp.float32)
    t = 0.1 * jax.random.normal(kt, (K, D), dtype=jnp.float32)

    fwd = jax.jit(normalizing_flow_forward,
                  static_argnames=("tb", "core_parallel"))

    z_ref, ld_ref, lp_ref = _reference_forward(x, s, t)

    # 1) Auto tile picker: B=512 -> tb=256 -> grid=(2,) (pipelined, shardable).
    z, log_det, prior_logprob = jax.block_until_ready(fwd(x, s, t))
    assert z.shape == (B, D) and log_det.shape == (B,) and prior_logprob.shape == (B,)
    assert jnp.allclose(z, z_ref, atol=1e-5, rtol=1e-5)
    assert jnp.allclose(log_det, ld_ref, atol=1e-4, rtol=1e-5)
    assert jnp.allclose(prior_logprob, lp_ref, atol=1e-3, rtol=1e-5)

    # 2) Explicit tb=128 -> grid=(4,): exercises the multi-step pipelined path.
    z2, ld2, lp2 = jax.block_until_ready(fwd(x, s, t, tb=128))
    assert jnp.allclose(z2, z_ref, atol=1e-5, rtol=1e-5)
    assert jnp.allclose(ld2, ld_ref, atol=1e-4, rtol=1e-5)
    assert jnp.allclose(lp2, lp_ref, atol=1e-3, rtol=1e-5)

    # 3) Ragged last tile: B=200 with tb=128 -> grid=(2,), masked writeback.
    xr = x[:200]
    zr_ref, ldr_ref, lpr_ref = _reference_forward(xr, s, t)
    zr, ldr, lpr = jax.block_until_ready(fwd(xr, s, t, tb=128))
    assert zr.shape == (200, D) and ldr.shape == (200,) and lpr.shape == (200,)
    assert jnp.allclose(zr, zr_ref, atol=1e-5, rtol=1e-5)
    assert jnp.allclose(ldr, ldr_ref, atol=1e-4, rtol=1e-5)
    assert jnp.allclose(lpr, lpr_ref, atol=1e-3, rtol=1e-5)

    # 4) bf16 I/O path: halves HBM traffic on this memory-bound kernel; the
    #    prior reduction stays in f32 in-kernel.
    xb = x.astype(jnp.bfloat16)
    zb_ref, ldb_ref, lpb_ref = _reference_forward(xb.astype(jnp.float32), s, t)
    zb, ldb, lpb = jax.block_until_ready(fwd(xb, s, t))
    assert zb.dtype == jnp.bfloat16
    assert jnp.allclose(zb.astype(jnp.float32), zb_ref, atol=5e-2, rtol=2e-2)
    assert jnp.allclose(ldb, ldb_ref, atol=1e-4, rtol=1e-5)
    assert jnp.allclose(lpb, lpb_ref, atol=1e-3, rtol=1e-5)

    print("KERNEL_OK")
</pallas_src>

<mosaic_0001>
module attributes {stable_mosaic.version = 11 : i64} {
  func.func @_nf_kernel(%arg0: i32, %arg1: memref<256x256xf32, #tpu.memory_space<vmem>>, %arg2: memref<1x256xf32, #tpu.memory_space<vmem>>, %arg3: memref<1x256xf32, #tpu.memory_space<vmem>>, %arg4: memref<256x256xf32, #tpu.memory_space<vmem>>, %arg5: memref<1x256xf32, #tpu.memory_space<vmem>>) attributes {dimension_semantics = [#tpu.dimension_semantics<parallel>], iteration_bounds = array<i64: 2>, scalar_prefetch = 0 : i64, scratch_operands = 0 : i64, tpu.core_type = #tpu.core_type<tc>, window_params = [{transform_indices = @transform_0, window_bounds = array<i64: 256, 256>}, {pipeline_mode = #tpu.pipeline_mode<synchronous>, transform_indices = @transform_1, window_bounds = array<i64: 1, 256>}, {pipeline_mode = #tpu.pipeline_mode<synchronous>, transform_indices = @transform_2, window_bounds = array<i64: 1, 256>}, {transform_indices = @transform_3, window_bounds = array<i64: 256, 256>}, {transform_indices = @transform_4, window_bounds = array<i64: 1, 256>}]} {
    %c0 = arith.constant 0 : index
    %c0_0 = arith.constant 0 : index
    %0 = vector.load %arg1[%c0, %c0_0] : memref<256x256xf32, #tpu.memory_space<vmem>>, vector<256x256xf32>
    %c0_1 = arith.constant 0 : index
    %c0_2 = arith.constant 0 : index
    %1 = vector.load %arg2[%c0_1, %c0_2] : memref<1x256xf32, #tpu.memory_space<vmem>>, vector<1x256xf32>
    %2 = vector.broadcast %1 : vector<1x256xf32> to vector<256x256xf32>
    %3 = arith.mulf %0, %2 : vector<256x256xf32>
    %c0_3 = arith.constant 0 : index
    %c0_4 = arith.constant 0 : index
    %4 = vector.load %arg3[%c0_3, %c0_4] : memref<1x256xf32, #tpu.memory_space<vmem>>, vector<1x256xf32>
    %5 = vector.broadcast %4 : vector<1x256xf32> to vector<256x256xf32>
    %6 = arith.addf %3, %5 : vector<256x256xf32>
    %c0_5 = arith.constant 0 : index
    %c0_6 = arith.constant 0 : index
    %7 = vector.load %arg4[%c0_5, %c0_6] : memref<256x256xf32, #tpu.memory_space<vmem>>, vector<256x256xf32>
    tpu.vector_store %arg4[%c0_5, %c0_6], %6 {strides = array<i32>} : memref<256x256xf32, #tpu.memory_space<vmem>>, vector<256x256xf32>,
    %8 = arith.mulf %6, %6 : vector<256x256xf32>
    %cst = arith.constant dense<0.000000e+00> : vector<256xf32>
    %9 = vector.multi_reduction <add>, %8, %cst [1] : vector<256x256xf32> to vector<256xf32>
    %cst_7 = arith.constant -5.000000e-01 : f32
    %10 = vector.broadcast %cst_7 : f32 to vector<256xf32>
    %11 = arith.mulf %10, %9 : vector<256xf32>
    %cst_8 = arith.constant 235.24826 : f32
    %12 = vector.broadcast %cst_8 : f32 to vector<256xf32>
    %13 = arith.subf %11, %12 : vector<256xf32>
    %14 = vector.shape_cast %13 : vector<256xf32> to vector<1x256xf32>
    %c0_9 = arith.constant 0 : index
    %c0_10 = arith.constant 0 : index
    %15 = vector.load %arg5[%c0_9, %c0_10] : memref<1x256xf32, #tpu.memory_space<vmem>>, vector<1x256xf32>
    tpu.vector_store %arg5[%c0_9, %c0_10], %14 {strides = array<i32>} : memref<1x256xf32, #tpu.memory_space<vmem>>, vector<1x256xf32>,
    return
  }
  func.func @transform_0(%arg0: i32) -> (i32, i32) {
    %c0_i32 = arith.constant 0 : i32
    %c0_i32_0 = arith.constant 0 : i32
    return %arg0, %c0_i32 : i32, i32
  }
  func.func @transform_1(%arg0: i32) -> (i32, i32) {
    %c0_i32 = arith.constant 0 : i32
    %c0_i32_0 = arith.constant 0 : i32
    %c0_i32_1 = arith.constant 0 : i32
    return %c0_i32, %c0_i32_0 : i32, i32
  }
  func.func @transform_2(%arg0: i32) -> (i32, i32) {
    %c0_i32 = arith.constant 0 : i32
    %c0_i32_0 = arith.constant 0 : i32
    %c0_i32_1 = arith.constant 0 : i32
    return %c0_i32, %c0_i32_0 : i32, i32
  }
  func.func @transform_3(%arg0: i32) -> (i32, i32) {
    %c0_i32 = arith.constant 0 : i32
    %c0_i32_0 = arith.constant 0 : i32
    return %arg0, %c0_i32 : i32, i32
  }
  func.func @transform_4(%arg0: i32) -> (i32, i32) {
    %c0_i32 = arith.constant 0 : i32
    %c0_i32_0 = arith.constant 0 : i32
    return %c0_i32, %arg0 : i32, i32
  }
}

</mosaic_0001>

<bundles_post_ra>
// kernel: normalizing_flow_forward.1
= control target key start
LH: loop header
LB: loop body
LE: loop exit
PB: predicated region body
PF: predicated region fallthrough
CT: control target
= control target key end

     0   :  { %10 = vsyncpa [#allocation3], 0  ;;  %s5454_s0 = inlined_call_operand.hbm [shape: f32[512,256], index: 0, kind: input, shape index: {}]   ;;  %s5455_s1 = inlined_call_operand.vmem [shape: f32[1,256], index: 1, kind: input, shape index: {}]   ;;  %s5456_s2 = inlined_call_operand.vmem [shape: f32[1,256], index: 2, kind: input, shape index: {}]   ;;  %s5457_s3 = inlined_call_operand.hbm [shape: f32[512,256], index: 3, kind: output, shape index: {0}]   ;;  %s5458_s4 = inlined_call_operand.hbm [shape: f32[1,512], index: 4, kind: output, shape index: {1}]  }
   0x1   :  { %12 = vsyncpa [#allocation3 + $0x1], 0 }
   0x2   :  { %13 = vsyncpa [#allocation4], 0 }
   0x3   :  { %15 = vsyncpa [#allocation4 + $0x1], 0 }
   0x4   :  { %16 = vsyncpa [#allocation7], 0 }
   0x5   :  { %18 = vsyncpa [#allocation7 + $0x1], 0  ;;  %s4085_s15 = smov 0   ;;  %s4087_s16 = smov 0  }
   0x6   :  { %s4089_s17 = smov 0   ;;  %s4091_s18 = smov 0  }
   0x7 LB: > { %s4106_s19 = sadd.s32 4294967295, %s4049_s18   ;;  %s3805_s20 = sadd.s32 4294967294, %s4049_s18   ;;  %s4049_s18 = sphi %s4091_s18, %s5471_s18   ;;  %s4045_s17 = sphi %s4089_s17, %s5470_s17   ;;  %s4041_s16 = sphi %s4087_s16, %s5469_s16   ;;  %s4037_s15 = sphi %s4085_s15, %s5468_s15  }
   0x8   : > { %s4110_s21 = sadd.s32 1, %s4049_s18   ;;  %s31_s22 = sadd.s32 1, %s4045_s17 }
   0x9   : > { %s28_s23 = ssub.s32 %s4049_s18, %s4110_s21  ;;  %p38_p0 = scmp.ne.s32.totalorder %s4045_s17, %s4041_s16 }
   0xa   : > { %p29_p1 = scmp.eq.s32.totalorder %s28_s23, 0  ;;  %p39_p2 = scmp.eq.s32.totalorder %s4049_s18, 0 }
   0xb   : > { %p44_p3 = scmp.ne.s32.totalorder %s4041_s16, %s4037_s15  ;;  %p45_p4 = scmp.eq.s32.totalorder %s4106_s19, 0 }
   0xc   : > { %s4122_s24 = scalar_select %p29_p1, %s4045_s17, %s31_s22  }
   0xd   : > { %p4124_p5 = por %p39_p2, %p38_p0  ;;  %p4128_p6 = por %p45_p4, %p44_p3 }
   0xe   : > { %p110_p7 = scmp.eq.s32.totalorder %s4106_s19, 1  ;;  %p116_p8 = scmp.eq.s32.totalorder %s3805_s20, 1 }
   0xf   : > { %p3879_p10 = scmp.lt.s32.totalorder %s4049_s18, 2  ;;  %s168_s29 = sand.u32 1, %s4045_s17  }
  0x10   : > { %p4135_p11 = por %p110_p7, %p38_p0  ;;  %p4139_p12 = por %p116_p8, %p44_p3 }
  0x11   : > { %s3858_s30 = sshll.u32 %s4049_s18, 13  ;;  %s3808_s5 = sshll.u32 %s168_s29, 9 }
  0x12   : > { %s5462_s27 = scalar_select %p4135_p11, 1, 0 }
  0x13   : > { %s5463_s28 = scalar_select %p4139_p12, 1, 0 }
  0x14   : > { %s4148_s8 = scalar_lea.hbm %s5454_s0, %s3858_s30  ;;  %s172_s9 = scalar_lea.vmem [#allocation2], %s3808_s5 }
  0x15   : > { %s180_s10 = sshll.u32 %s172_s9, 4  ;;  %p4152_p13 = pnand %p3879_p10, %p4124_p5  ;;  %s4156_s10 = int_to_ptr.vmem [resolvable:$true] %s180_s10 }
  0x16   : > { %s4158_s12 = scalar_lea.sflag [#allocation3], %s168_s29  ;;  %s3921_s13 = scalar_lea.hbm %s4148_s8, 8192 }
  0x17   : > { %p3922_p0 = scmp.ne.s32.totalorder %s4148_s8, %s3921_s13  ;;  %p3923_p1 = pneg %p4152_p13 }
  0x18   : > { %s3926_s22 = scalar_lea.hbm %s5454_s0, 16384  ;;  %p3927_p4 = scmp.lt.u32.totalorder %s4148_s8, %s5454_s0 }
  0x19   : > { %p3924_p2 = pnand %p3923_p1, %p3922_p0  ;;  %p3928_p5 = scmp.lt.u32.totalorder %s3926_s22, %s3921_s13 }
  0x1a   : > { %p3930_p8 = scmp.lt.u32.totalorder %s3921_s13, %s4148_s8 }
  0x1b   : > { %p3925_p3 = pneg %p3924_p2  ;;  %p3929_p7 = por %p3928_p5, %p3927_p4 }
  0x1d   : > { %p3931_p10 = por %p3930_p8, %p3929_p7 }
  0x1f   : > { %p3932_p9 = pnand %p3931_p10, %p3925_p3 }
  0x21   : > { %3935 = shalt.err (!%p3932_p9)
}
  0x22   : > { %s3936_s29 = scalar_lea.vmem %s4156_s10, 8192  ;;  %s4051_s30 = smov [#allocation2]  }
  0x23   : > { %p3937_p0 = scmp.ne.s32.totalorder %s4156_s10, %s3936_s29  ;;  %s3941_s5 = sshll.u32 %s4051_s30, 4  ;;  %s3942_s5 = int_to_ptr.vmem [resolvable:$false] %s3941_s5 }
  0x24   : > { %s3943_s6 = scalar_lea.vmem %s3942_s5, 16384  ;;  %p3944_p11 = scmp.lt.s32.totalorder %s4156_s10, %s3942_s5 }
  0x25   : > { %p3939_p2 = pnand %p3937_p0, %p3923_p1  ;;  %p3945_p4 = scmp.lt.s32.totalorder %s3943_s6, %s3936_s29 }
  0x27   : > { %p3940_p12 = pneg %p3939_p2  ;;  %p3946_p5 = por %p3945_p4, %p3944_p11 }
  0x29   : > { %p3947_p7 = pnand %p3946_p5, %p3940_p12 }
  0x2b   : > { %3950 = shalt.err (!%p3947_p7)
}
  0x2c   : > { %s4052_s7 = smov 256   ;;  %s4053_s9 = smov 16  }
  0x2d   : > { %3871 = dma.hbm_to_vmem [thread:$0]  (!%p4152_p13), %s4148_s8, 8192, %s4156_s10, %s4158_s12, %s4052_s7, %s4052_s7, %s4053_s9  }
  0x2e   : > { %p3812_p9 = scmp.ge.s32.totalorder %s4049_s18, 1  ;;  %p188_p1 = scmp.lt.s32.totalorder %s4049_s18, 3 }
  0x30   : > { %p189_p3 = pnand %p3812_p9, %p188_p1 }
  0x31   : > { %s4189_s13 = sand.u32 (!%p189_p3), 1, %s4041_s16  }
  0x32   : > { %192 = sbr.rel (%p189_p3) target bundleno = 562 (0x232), region = 32  ;;  %s3813_s14 = sshll.u32 (!%p189_p3), %s4189_s13, 9 }
  0x33   : > { %s195_s20 = scalar_lea.sflag (!%p189_p3), [#allocation3], %s4189_s13  ;;  %s4195_s22 = scalar_lea.vmem (!%p189_p3), [#allocation2], %s3813_s14 }
  0x39   : > { %4024 = dma.done.wait (%p4128_p6), %s195_s20, 8192  }
  0x3a   : > { %4026 = vsyncadd (%p4128_p6), %s195_s20, 4294959104  ;;  %v297_v0 = vlaneseq  ;;  %v235_v4 = vld [vmem:[%s4195_s22 + $0x20] sm:$0xff]  ;;  %v236_v5 = vld [vmem:[%s4195_s22 + $0x28] sm:$0xff]  ;;  %s4256_s12 = scalar_lea.vmem [#allocation5], %s3813_s14  ;;  %s3860_s23 = sshll.u32 %s4106_s19, 13 }
  0x3b   : > { %v295_v6 = vld [vmem:[%s5455_s1] sm:$0x3]  ;;  %v232_v11 = vld [vmem:[%s4195_s22 + $0x8] sm:$0xff]  ;;  %v237_v14 = vld [vmem:[%s4195_s22 + $0x30] sm:$0xff]  ;;  %s5261_s30 = scalar_lea.hbm %s5457_s3, %s3860_s23  ;;  %s3686_s5 = sshll.u32 %s4256_s12, 4  ;;  %s5264_s5 = int_to_ptr.vmem [resolvable:$true] %s3686_s5 }
  0x3c   : > { %v4202_v1 = vshrl.u32 %v297_v0, 7  ;;  %v371_v9 = vld [vmem:[%s5456_s2] sm:$0x3]  ;;  %v238_v15 = vld [vmem:[%s4195_s22 + $0x38] sm:$0xff]  ;;  %v233_v16 = vld [vmem:[%s4195_s22 + $0x10] sm:$0xff]  ;;  %s3667_s6 = scalar_lea.sflag [#allocation4], %s4189_s13 }
  0x3d   : > { %v231_v10 = vld [vmem:[%s4195_s22] sm:$0xff]  ;;  %v234_v21 = vld [vmem:[%s4195_s22 + $0x18] sm:$0xff]  ;;  %v241_v34 = vld [vmem:[%s4195_s22 + $0x50] sm:$0xff]  ;;  %s3951_s7 = scalar_lea.vmem %s5264_s5, 8192  ;;  %p5465_p11 = scmp.ne.s32.totalorder %s5462_s27, 0 }
  0x3e   : > { %v4205_v2 = vsub.s32 0, %v4202_v1  ;;  %v4208_v3 = vsub.s32 1, %v4202_v1  ;;  %v242_v35 = vld [vmem:[%s4195_s22 + $0x58] sm:$0xff]  ;;  %v239_v40 = vld [vmem:[%s4195_s22 + $0x40] sm:$0xff]  ;;  %v240_v41 = vld [vmem:[%s4195_s22 + $0x48] sm:$0xff]  ;;  %p3952_p6 = scmp.ne.s32.totalorder %s5264_s5, %s3951_s7  ;;  %s4056_s9 = smov [#allocation5]  }
  0x3f   : > { %v245_v46 = vld [vmem:[%s4195_s22 + $0x70] sm:$0xff]  ;;  %v246_v51 = vld [vmem:[%s4195_s22 + $0x78] sm:$0xff]  ;;  %v243_v52 = vld [vmem:[%s4195_s22 + $0x60] sm:$0xff]  ;;  %s3955_s14 = sshll.u32 %s4056_s9, 4  ;;  %s3956_s14 = int_to_ptr.vmem [resolvable:$false] %s3955_s14 }
  0x40   : > { %v4216_v7 = vrot.slane %v295_v6, %v4205_v2  ;;  %v4219_v8 = vrot.slane %v295_v6, %v4208_v3  ;;  %v4227_v12 = vrot.slane %v371_v9, %v4205_v2  ;;  %v4230_v13 = vrot.slane %v371_v9, %v4208_v3  ;;  %v244_v57 = vld [vmem:[%s4195_s22 + $0x68] sm:$0xff]  ;;  %p3953_p12 = pnand %p3952_p6, %p5465_p11  ;;  %s3957_s20 = scalar_lea.vmem %s3956_s14, 16384 }
  0x41   : > { %p3958_p8 = scmp.lt.s32.totalorder %s5264_s5, %s3956_s14  ;;  %p3959_p10 = scmp.lt.s32.totalorder %s3957_s20, %s3951_s7 }
  0x42   : > { %v311_v17 = vmul.f32 %v4216_v7, %v235_v4  ;;  %v312_v18 = vmul.f32 %v4219_v8, %v236_v5  ;;  %v307_v19 = vmul.f32 %v4216_v7, %v231_v10  ;;  %v308_v20 = vmul.f32 %v4219_v8, %v232_v11  ;;  %v249_v11 = vld [vmem:[%s4195_s22 + $0x90] sm:$0xff]  ;;  %p3954_p13 = pneg %p3953_p12 }
  0x43   : > { %v313_v22 = vmul.f32 %v4216_v7, %v237_v14  ;;  %v314_v23 = vmul.f32 %v4219_v8, %v238_v15  ;;  %v309_v24 = vmul.f32 %v4216_v7, %v233_v16  ;;  %v310_v25 = vmul.f32 %v4219_v8, %v234_v21  ;;  %p3960_p0 = por %p3959_p10, %p3958_p8 }
  0x44   : > { %v387_v26 = vadd.f32 %v4227_v12, %v311_v17  ;;  %v388_v27 = vadd.f32 %v4230_v13, %v312_v18  ;;  %v383_v28 = vadd.f32 %v4227_v12, %v307_v19  ;;  %v384_v29 = vadd.f32 %v4230_v13, %v308_v20  ;;  %v250_v18 = vld [vmem:[%s4195_s22 + $0x98] sm:$0xff]  ;;  %v247_v19 = vld [vmem:[%s4195_s22 + $0x80] sm:$0xff]  ;;  %v248_v20 = vld [vmem:[%s4195_s22 + $0x88] sm:$0xff] }
  0x45   : > { %v389_v30 = vadd.f32 %v4227_v12, %v313_v22  ;;  %v390_v31 = vadd.f32 %v4230_v13, %v314_v23  ;;  %v385_v32 = vadd.f32 %v4227_v12, %v309_v24  ;;  %v386_v33 = vadd.f32 %v4230_v13, %v310_v25  ;;  %v253_v24 = vld [vmem:[%s4195_s22 + $0xb0] sm:$0xff]  ;;  %v254_v25 = vld [vmem:[%s4195_s22 + $0xb8] sm:$0xff]  ;;  %p3961_p2 = pnand %p3960_p0, %p3954_p13 }
  0x46   : > { %452 = vst [vmem:[%s4256_s12 + $0x28] sm:$0xff] %v388_v27  ;;  %v515_v36 = vmul.f32 %v387_v26, %v387_v26  ;;  %v516_v37 = vmul.f32 %v388_v27, %v388_v27  ;;  %451 = vst [vmem:[%s4256_s12 + $0x20] sm:$0xff] %v387_v26  ;;  %v511_v38 = vmul.f32 %v383_v28, %v383_v28 }
  0x47   : > { %448 = vst [vmem:[%s4256_s12 + $0x8] sm:$0xff] %v384_v29  ;;  %v512_v39 = vmul.f32 %v384_v29, %v384_v29  ;;  %447 = vst [vmem:[%s4256_s12] sm:$0xff] %v383_v28  ;;  %v517_v42 = vmul.f32 %v389_v30, %v389_v30  ;;  %v518_v43 = vmul.f32 %v390_v31, %v390_v31 }
  0x48   : > { %453 = vst [vmem:[%s4256_s12 + $0x30] sm:$0xff] %v389_v30  ;;  %454 = vst [vmem:[%s4256_s12 + $0x38] sm:$0xff] %v390_v31  ;;  %v513_v44 = vmul.f32 %v385_v32, %v385_v32  ;;  %v514_v45 = vmul.f32 %v386_v33, %v386_v33  ;;  %v581_v47 = vadd.f32 %v516_v37, %v515_v36 }
  0x49   : > { %449 = vst [vmem:[%s4256_s12 + $0x10] sm:$0xff] %v385_v32  ;;  %450 = vst [vmem:[%s4256_s12 + $0x18] sm:$0xff] %v386_v33  ;;  %v575_v48 = vadd.f32 %v512_v39, %v511_v38  ;;  %v317_v49 = vmul.f32 %v4216_v7, %v241_v34  ;;  %v318_v50 = vmul.f32 %v4219_v8, %v242_v35  ;;  %v251_v38 = vld [vmem:[%s4195_s22 + $0xa0] sm:$0xff]  ;;  %v252_v39 = vld [vmem:[%s4195_s22 + $0xa8] sm:$0xff] }
  0x4a   : > { %v584_v53 = vadd.f32 %v518_v43, %v517_v42  ;;  %v578_v54 = vadd.f32 %v514_v45, %v513_v44  ;;  %v315_v55 = vmul.f32 %v4216_v7, %v239_v40  ;;  %v316_v56 = vmul.f32 %v4219_v8, %v240_v41  ;;  %582 = vadd.xlane.f32.xlu1 %v581_v47  ;;  %v257_v43 = vld [vmem:[%s4195_s22 + $0xd0] sm:$0xff] }
  0x4b   : > { %576 = vadd.xlane.f32.xlu0 %v575_v48  ;;  %v393_v58 = vadd.f32 %v4227_v12, %v317_v49  ;;  %v394_v59 = vadd.f32 %v4230_v13, %v318_v50  ;;  %v321_v60 = vmul.f32 %v4216_v7, %v245_v46  ;;  %v322_v63 = vmul.f32 %v4219_v8, %v246_v51 }
  0x4c   : > { %v391_v61 = vadd.f32 %v4227_v12, %v315_v55  ;;  %v392_v62 = vadd.f32 %v4230_v13, %v316_v56  ;;  %v319_v4 = vmul.f32 %v4216_v7, %v243_v52  ;;  %v320_v10 = vmul.f32 %v4219_v8, %v244_v57  ;;  %v258_v52 = vld [vmem:[%s4195_s22 + $0xd8] sm:$0xff]  ;;  %v255_v57 = vld [vmem:[%s4195_s22 + $0xc0] sm:$0xff] }
  0x4d   : > { %457 = vst [vmem:[%s4256_s12 + $0x50] sm:$0xff] %v393_v58  ;;  %458 = vst [vmem:[%s4256_s12 + $0x58] sm:$0xff] %v394_v59  ;;  %v521_v5 = vmul.f32 %v393_v58, %v393_v58  ;;  %v522_v6 = vmul.f32 %v394_v59, %v394_v59  ;;  %v397_v9 = vadd.f32 %v4227_v12, %v321_v60  ;;  %v256_v58 = vld [vmem:[%s4195_s22 + $0xc8] sm:$0xff] }
  0x4e   : > { %455 = vst [vmem:[%s4256_s12 + $0x40] sm:$0xff] %v391_v61  ;;  %456 = vst [vmem:[%s4256_s12 + $0x48] sm:$0xff] %v392_v62  ;;  %v519_v14 = vmul.f32 %v391_v61, %v391_v61  ;;  %v520_v15 = vmul.f32 %v392_v62, %v392_v62  ;;  %v398_v16 = vadd.f32 %v4230_v13, %v322_v63  ;;  %585 = vadd.xlane.f32.xlu1 %v584_v53  ;;  %v261_v62 = vld [vmem:[%s4195_s22 + $0xf0] sm:$0xff]  ;;  %v262_v63 = vld [vmem:[%s4195_s22 + $0xf8] sm:$0xff] }
  0x4f   : > { %v395_v17 = vadd.f32 %v4227_v12, %v319_v4  ;;  %579 = vadd.xlane.f32.xlu0 %v578_v54  ;;  %v590_v21 = vadd.f32 %v522_v6, %v521_v5  ;;  %461 = vst [vmem:[%s4256_s12 + $0x70] sm:$0xff] %v397_v9  ;;  %v525_v22 = vmul.f32 %v397_v9, %v397_v9 }
  0x50   : > { %v396_v23 = vadd.f32 %v4230_v13, %v320_v10  ;;  %v587_v26 = vadd.f32 %v520_v15, %v519_v14  ;;  %462 = vst [vmem:[%s4256_s12 + $0x78] sm:$0xff] %v398_v16  ;;  %v526_v27 = vmul.f32 %v398_v16, %v398_v16  ;;  %v325_v29 = vmul.f32 %v4216_v7, %v249_v11  ;;  %v259_v16 = vld [vmem:[%s4195_s22 + $0xe0] sm:$0xff] }
  0x51   : > { %459 = vst [vmem:[%s4256_s12 + $0x60] sm:$0xff] %v395_v17  ;;  %v523_v28 = vmul.f32 %v395_v17, %v395_v17  ;;  %v326_v31 = vmul.f32 %v4219_v8, %v250_v18  ;;  %v323_v32 = vmul.f32 %v4216_v7, %v247_v19  ;;  %v324_v33 = vmul.f32 %v4219_v8, %v248_v20 }
  0x52   : > { %460 = vst [vmem:[%s4256_s12 + $0x68] sm:$0xff] %v396_v23  ;;  %v524_v30 = vmul.f32 %v396_v23, %v396_v23  ;;  %v596_v34 = vadd.f32 %v526_v27, %v525_v22  ;;  %v401_v35 = vadd.f32 %v4227_v12, %v325_v29  ;;  %v329_v36 = vmul.f32 %v4216_v7, %v253_v24  ;;  %v265_v22 = vld [vmem:[%s4195_s22 + $0x110] sm:$0xff] }
  0x53   : > { %v330_v37 = vmul.f32 %v4219_v8, %v254_v25  ;;  %591 = vadd.xlane.f32.xlu1 %v590_v21  ;;  %588 = vadd.xlane.f32.xlu0 %v587_v26  ;;  %v402_v41 = vadd.f32 %v4230_v13, %v326_v31  ;;  %v399_v42 = vadd.f32 %v4227_v12, %v323_v32  ;;  %v260_v21 = vld [vmem:[%s4195_s22 + $0xe8] sm:$0xff] }
  0x54   : > { %v593_v40 = vadd.f32 %v524_v30, %v523_v28  ;;  %465 = vst [vmem:[%s4256_s12 + $0x90] sm:$0xff] %v401_v35  ;;  %v529_v44 = vmul.f32 %v401_v35, %v401_v35  ;;  %v400_v45 = vadd.f32 %v4230_v13, %v324_v33  ;;  %v405_v46 = vadd.f32 %v4227_v12, %v329_v36  ;;  %v266_v30 = vld [vmem:[%s4195_s22 + $0x118] sm:$0xff]  ;;  %v263_v35 = vld [vmem:[%s4195_s22 + $0x100] sm:$0xff] }
  0x55   : > { %v406_v47 = vadd.f32 %v4230_v13, %v330_v37  ;;  %466 = vst [vmem:[%s4256_s12 + $0x98] sm:$0xff] %v402_v41  ;;  %v530_v48 = vmul.f32 %v402_v41, %v402_v41  ;;  %463 = vst [vmem:[%s4256_s12 + $0x80] sm:$0xff] %v399_v42  ;;  %v527_v49 = vmul.f32 %v399_v42, %v399_v42  ;;  %v269_v41 = vld [vmem:[%s4195_s22 + $0x130] sm:$0xff] }
  0x56   : > { %v327_v50 = vmul.f32 %v4216_v7, %v251_v38  ;;  %v328_v51 = vmul.f32 %v4219_v8, %v252_v39  ;;  %464 = vst [vmem:[%s4256_s12 + $0x88] sm:$0xff] %v400_v45  ;;  %v528_v53 = vmul.f32 %v400_v45, %v400_v45  ;;  %469 = vst [vmem:[%s4256_s12 + $0xb0] sm:$0xff] %v405_v46  ;;  %v270_v45 = vld [vmem:[%s4195_s22 + $0x138] sm:$0xff] }
  0x57   : > { %470 = vst [vmem:[%s4256_s12 + $0xb8] sm:$0xff] %v406_v47  ;;  %v533_v54 = vmul.f32 %v405_v46, %v405_v46  ;;  %v534_v55 = vmul.f32 %v406_v47, %v406_v47  ;;  %v333_v56 = vmul.f32 %v4216_v7, %v257_v43  ;;  %597 = vadd.xlane.f32.xlu1 %v596_v34  ;;  %v267_v46 = vld [vmem:[%s4195_s22 + $0x120] sm:$0xff] }
  0x58   : > { %594 = vadd.xlane.f32.xlu0 %v593_v40  ;;  %v602_v59 = vadd.f32 %v530_v48, %v529_v44  ;;  %v403_v60 = vadd.f32 %v4227_v12, %v327_v50  ;;  %v404_v61 = vadd.f32 %v4230_v13, %v328_v51  ;;  %v599_v4 = vadd.f32 %v528_v53, %v527_v49  ;;  %v264_v40 = vld [vmem:[%s4195_s22 + $0x108] sm:$0xff] }
  0x59   : > { %v608_v5 = vadd.f32 %v534_v55, %v533_v54  ;;  %v334_v6 = vmul.f32 %v4219_v8, %v258_v52  ;;  %v409_v9 = vadd.f32 %v4227_v12, %v333_v56  ;;  %v331_v14 = vmul.f32 %v4216_v7, %v255_v57  ;;  %v268_v55 = vld [vmem:[%s4195_s22 + $0x128] sm:$0xff] }
  0x5a   : > { %467 = vst [vmem:[%s4256_s12 + $0xa0] sm:$0xff] %v403_v60  ;;  %468 = vst [vmem:[%s4256_s12 + $0xa8] sm:$0xff] %v404_v61  ;;  %v531_v10 = vmul.f32 %v403_v60, %v403_v60  ;;  %v532_v11 = vmul.f32 %v404_v61, %v404_v61  ;;  %v332_v15 = vmul.f32 %v4219_v8, %v256_v58  ;;  %v273_v60 = vld [vmem:[%s4195_s22 + $0x150] sm:$0xff] }
  0x5b   : > { %v410_v17 = vadd.f32 %v4230_v13, %v334_v6  ;;  %473 = vst [vmem:[%s4256_s12 + $0xd0] sm:$0xff] %v409_v9  ;;  %v537_v18 = vmul.f32 %v409_v9, %v409_v9  ;;  %v337_v19 = vmul.f32 %v4216_v7, %v261_v62  ;;  %v338_v20 = vmul.f32 %v4219_v8, %v262_v63 }
  0x5c   : > { %603 = vadd.xlane.f32.xlu1 %v602_v59  ;;  %600 = vadd.xlane.f32.xlu0 %v599_v4  ;;  %v605_v23 = vadd.f32 %v532_v11, %v531_v10  ;;  %v407_v24 = vadd.f32 %v4227_v12, %v331_v14  ;;  %v408_v25 = vadd.f32 %v4230_v13, %v332_v15  ;;  %v274_v4 = vld [vmem:[%s4195_s22 + $0x158] sm:$0xff] }
  0x5d   : > { %474 = vst [vmem:[%s4256_s12 + $0xd8] sm:$0xff] %v410_v17  ;;  %v538_v26 = vmul.f32 %v410_v17, %v410_v17  ;;  %v413_v27 = vadd.f32 %v4227_v12, %v337_v19  ;;  %v414_v28 = vadd.f32 %v4230_v13, %v338_v20  ;;  %v335_v29 = vmul.f32 %v4216_v7, %v259_v16  ;;  %v271_v17 = vld [vmem:[%s4195_s22 + $0x140] sm:$0xff] }
  0x5e   : > { %471 = vst [vmem:[%s4256_s12 + $0xc0] sm:$0xff] %v407_v24  ;;  %472 = vst [vmem:[%s4256_s12 + $0xc8] sm:$0xff] %v408_v25  ;;  %v535_v31 = vmul.f32 %v407_v24, %v407_v24  ;;  %v536_v32 = vmul.f32 %v408_v25, %v408_v25  ;;  %v336_v33 = vmul.f32 %v4219_v8, %v260_v21  ;;  %v278_v24 = vld [vmem:[%s4195_s22 + $0x178] sm:$0xff] }
  0x5f   : > { %v341_v34 = vmul.f32 %v4216_v7, %v265_v22  ;;  %v614_v36 = vadd.f32 %v538_v26, %v537_v18  ;;  %477 = vst [vmem:[%s4256_s12 + $0xf0] sm:$0xff] %v413_v27  ;;  %478 = vst [vmem:[%s4256_s12 + $0xf8] sm:$0xff] %v414_v28  ;;  %v541_v37 = vmul.f32 %v413_v27, %v413_v27  ;;  %v272_v22 = vld [vmem:[%s4195_s22 + $0x148] sm:$0xff] }
  0x60   : > { %v542_v38 = vmul.f32 %v414_v28, %v414_v28  ;;  %v411_v39 = vadd.f32 %v4227_v12, %v335_v29  ;;  %609 = vadd.xlane.f32.xlu1 %v608_v5  ;;  %606 = vadd.xlane.f32.xlu0 %v605_v23  ;;  %v611_v42 = vadd.f32 %v536_v32, %v535_v31  ;;  %v277_v23 = vld [vmem:[%s4195_s22 + $0x170] sm:$0xff]  ;;  %v275_v28 = vld [vmem:[%s4195_s22 + $0x160] sm:$0xff] }
  0x61   : > { %v412_v43 = vadd.f32 %v4230_v13, %v336_v33  ;;  %v342_v44 = vmul.f32 %v4219_v8, %v266_v30  ;;  %v417_v49 = vadd.f32 %v4227_v12, %v341_v34  ;;  %v339_v50 = vmul.f32 %v4216_v7, %v263_v35 }
  0x62   : > { %v620_v47 = vadd.f32 %v542_v38, %v541_v37  ;;  %475 = vst [vmem:[%s4256_s12 + $0xe0] sm:$0xff] %v411_v39  ;;  %v539_v48 = vmul.f32 %v411_v39, %v411_v39  ;;  %v340_v53 = vmul.f32 %v4219_v8, %v264_v40  ;;  %v345_v54 = vmul.f32 %v4216_v7, %v269_v41  ;;  %v276_v38 = vld [vmem:[%s4195_s22 + $0x168] sm:$0xff] }
  0x63   : > { %476 = vst [vmem:[%s4256_s12 + $0xe8] sm:$0xff] %v412_v43  ;;  %v540_v51 = vmul.f32 %v412_v43, %v412_v43  ;;  %v418_v52 = vadd.f32 %v4230_v13, %v342_v44  ;;  %481 = vst [vmem:[%s4256_s12 + $0x110] sm:$0xff] %v417_v49  ;;  %v545_v56 = vmul.f32 %v417_v49, %v417_v49  ;;  %v4054_v33 = vmov 0   ;;  %v281_v43 = vld [vmem:[%s4195_s22 + $0x190] sm:$0xff] }
  0x64   : > { %v415_v57 = vadd.f32 %v4227_v12, %v339_v50  ;;  %v346_v58 = vmul.f32 %v4219_v8, %v270_v45  ;;  %v343_v59 = vmul.f32 %v4216_v7, %v267_v46  ;;  %615 = vadd.xlane.f32.xlu1 %v614_v36  ;;  %612 = vadd.xlane.f32.xlu0 %v611_v42 }
  0x65   : > { %v617_v61 = vadd.f32 %v540_v51, %v539_v48  ;;  %482 = vst [vmem:[%s4256_s12 + $0x118] sm:$0xff] %v418_v52  ;;  %v546_v62 = vmul.f32 %v418_v52, %v418_v52  ;;  %v416_v63 = vadd.f32 %v4230_v13, %v340_v53  ;;  %v421_v6 = vadd.f32 %v4227_v12, %v345_v54  ;;  %v279_v48 = vld [vmem:[%s4195_s22 + $0x180] sm:$0xff] }
  0x66   : > { %479 = vst [vmem:[%s4256_s12 + $0x100] sm:$0xff] %v415_v57  ;;  %v543_v5 = vmul.f32 %v415_v57, %v415_v57  ;;  %v422_v9 = vadd.f32 %v4230_v13, %v346_v58  ;;  %v344_v10 = vmul.f32 %v4219_v8, %v268_v55  ;;  %v419_v15 = vadd.f32 %v4227_v12, %v343_v59  ;;  %v280_v57 = vld [vmem:[%s4195_s22 + $0x188] sm:$0xff] }
  0x67   : > { %v626_v11 = vadd.f32 %v546_v62, %v545_v56  ;;  %480 = vst [vmem:[%s4256_s12 + $0x108] sm:$0xff] %v416_v63  ;;  %v544_v14 = vmul.f32 %v416_v63, %v416_v63  ;;  %v349_v16 = vmul.f32 %v4216_v7, %v273_v60  ;;  %485 = vst [vmem:[%s4256_s12 + $0x130] sm:$0xff] %v421_v6  ;;  %3919 = vset.pattern.permute.xlu0 %v4054_v33  ;;  %v283_v62 = vld [vmem:[%s4195_s22 + $0x1a0] sm:$0xff]  ;;  %v284_v63 = vld [vmem:[%s4195_s22 + $0x1a8] sm:$0xff] }
  0x68   : > { %486 = vst [vmem:[%s4256_s12 + $0x138] sm:$0xff] %v422_v9  ;;  %v549_v18 = vmul.f32 %v421_v6, %v421_v6  ;;  %v550_v19 = vmul.f32 %v422_v9, %v422_v9  ;;  %v420_v20 = vadd.f32 %v4230_v13, %v344_v10  ;;  %v350_v21 = vmul.f32 %v4219_v8, %v274_v4  ;;  %v285_v4 = vld [vmem:[%s4195_s22 + $0x1b0] sm:$0xff] }
  0x69   : > { %621 = vadd.xlane.f32.xlu1 %v620_v47  ;;  %618 = vadd.xlane.f32.xlu0 %v617_v61  ;;  %v623_v25 = vadd.f32 %v544_v14, %v543_v5  ;;  %483 = vst [vmem:[%s4256_s12 + $0x120] sm:$0xff] %v419_v15  ;;  %v547_v26 = vmul.f32 %v419_v15, %v419_v15  ;;  %v282_v47 = vld [vmem:[%s4195_s22 + $0x198] sm:$0xff] }
  0x6a   : > { %v425_v27 = vadd.f32 %v4227_v12, %v349_v16  ;;  %v632_v29 = vadd.f32 %v550_v19, %v549_v18  ;;  %484 = vst [vmem:[%s4256_s12 + $0x128] sm:$0xff] %v420_v20  ;;  %v548_v30 = vmul.f32 %v420_v20, %v420_v20  ;;  %v426_v31 = vadd.f32 %v4230_v13, %v350_v21  ;;  %v286_v16 = vld [vmem:[%s4195_s22 + $0x1b8] sm:$0xff]  ;;  %v287_v21 = vld [vmem:[%s4195_s22 + $0x1c0] sm:$0xff] }
  0x6b   : > { %v347_v32 = vmul.f32 %v4216_v7, %v271_v17  ;;  %v348_v35 = vmul.f32 %v4219_v8, %v272_v22  ;;  %v353_v36 = vmul.f32 %v4216_v7, %v277_v23  ;;  %v354_v37 = vmul.f32 %v4219_v8, %v278_v24  ;;  %3920 = vset.pattern.permute.xlu1 %v4054_v33 }
  0x6c   : > { %489 = vst [vmem:[%s4256_s12 + $0x150] sm:$0xff] %v425_v27  ;;  %v553_v34 = vmul.f32 %v425_v27, %v425_v27  ;;  %v629_v39 = vadd.f32 %v548_v30, %v547_v26  ;;  %490 = vst [vmem:[%s4256_s12 + $0x158] sm:$0xff] %v426_v31  ;;  %v554_v40 = vmul.f32 %v426_v31, %v426_v31  ;;  %v288_v26 = vld [vmem:[%s4195_s22 + $0x1c8] sm:$0xff]  ;;  %v289_v30 = vld [vmem:[%s4195_s22 + $0x1d0] sm:$0xff] }
  0x6d   : > { %v423_v41 = vadd.f32 %v4227_v12, %v347_v32  ;;  %v351_v42 = vmul.f32 %v4216_v7, %v275_v28  ;;  %627 = vadd.xlane.f32.xlu1 %v626_v11  ;;  %624 = vadd.xlane.f32.xlu0 %v623_v25  ;;  %v424_v44 = vadd.f32 %v4230_v13, %v348_v35 }
  0x6e   : > { %v429_v45 = vadd.f32 %v4227_v12, %v353_v36  ;;  %v430_v46 = vadd.f32 %v4230_v13, %v354_v37  ;;  %v638_v49 = vadd.f32 %v554_v40, %v553_v34  ;;  %v352_v51 = vmul.f32 %v4219_v8, %v276_v38  ;;  %v290_v38 = vld [vmem:[%s4195_s22 + $0x1d8] sm:$0xff] }
  0x6f   : > { %487 = vst [vmem:[%s4256_s12 + $0x140] sm:$0xff] %v423_v41  ;;  %v551_v50 = vmul.f32 %v423_v41, %v423_v41  ;;  %v427_v52 = vadd.f32 %v4227_v12, %v351_v42  ;;  %488 = vst [vmem:[%s4256_s12 + $0x148] sm:$0xff] %v424_v44  ;;  %v552_v53 = vmul.f32 %v424_v44, %v424_v44  ;;  %v292_v44 = vld [vmem:[%s4195_s22 + $0x1e8] sm:$0xff] }
  0x70   : > { %493 = vst [vmem:[%s4256_s12 + $0x170] sm:$0xff] %v429_v45  ;;  %494 = vst [vmem:[%s4256_s12 + $0x178] sm:$0xff] %v430_v46  ;;  %v557_v54 = vmul.f32 %v429_v45, %v429_v45  ;;  %v558_v55 = vmul.f32 %v430_v46, %v430_v46  ;;  %v357_v56 = vmul.f32 %v4216_v7, %v281_v43  ;;  %v293_v45 = vld [vmem:[%s4195_s22 + $0x1f0] sm:$0xff] }
  0x71   : > { %v428_v58 = vadd.f32 %v4230_v13, %v352_v51  ;;  %491 = vst [vmem:[%s4256_s12 + $0x160] sm:$0xff] %v427_v52  ;;  %v555_v59 = vmul.f32 %v427_v52, %v427_v52  ;;  %v358_v60 = vmul.f32 %v4219_v8, %v282_v47  ;;  %v355_v61 = vmul.f32 %v4216_v7, %v279_v48 }
  0x72   : > { %633 = vadd.xlane.f32.xlu1 %v632_v29  ;;  %630 = vadd.xlane.f32.xlu0 %v629_v39  ;;  %v635_v5 = vadd.f32 %v552_v53, %v551_v50  ;;  %v644_v6 = vadd.f32 %v558_v55, %v557_v54  ;;  %v433_v9 = vadd.f32 %v4227_v12, %v357_v56  ;;  %v291_v39 = vld [vmem:[%s4195_s22 + $0x1e0] sm:$0xff] }
  0x73   : > { %492 = vst [vmem:[%s4256_s12 + $0x168] sm:$0xff] %v428_v58  ;;  %v556_v10 = vmul.f32 %v428_v58, %v428_v58  ;;  %v434_v11 = vadd.f32 %v4230_v13, %v358_v60  ;;  %v356_v14 = vmul.f32 %v4219_v8, %v280_v57  ;;  %v431_v15 = vadd.f32 %v4227_v12, %v355_v61 }
  0x74   : > { %497 = vst [vmem:[%s4256_s12 + $0x190] sm:$0xff] %v433_v9  ;;  %v561_v17 = vmul.f32 %v433_v9, %v433_v9  ;;  %v359_v18 = vmul.f32 %v4216_v7, %v283_v62  ;;  %v360_v19 = vmul.f32 %v4219_v8, %v284_v63  ;;  %v361_v20 = vmul.f32 %v4216_v7, %v285_v4 }
  0x75   : > { %v641_v22 = vadd.f32 %v556_v10, %v555_v59  ;;  %498 = vst [vmem:[%s4256_s12 + $0x198] sm:$0xff] %v434_v11  ;;  %v562_v23 = vmul.f32 %v434_v11, %v434_v11  ;;  %v432_v24 = vadd.f32 %v4230_v13, %v356_v14  ;;  %495 = vst [vmem:[%s4256_s12 + $0x180] sm:$0xff] %v431_v15 }
  0x76   : > { %v559_v25 = vmul.f32 %v431_v15, %v431_v15  ;;  %639 = vadd.xlane.f32.xlu1 %v638_v49  ;;  %636 = vadd.xlane.f32.xlu0 %v635_v5  ;;  %v435_v27 = vadd.f32 %v4227_v12, %v359_v18  ;;  %v436_v28 = vadd.f32 %v4230_v13, %v360_v19  ;;  %v294_v49 = vld [vmem:[%s4195_s22 + $0x1f8] sm:$0xff] }
  0x77   : > { %v362_v29 = vmul.f32 %v4219_v8, %v286_v16  ;;  %496 = vst [vmem:[%s4256_s12 + $0x188] sm:$0xff] %v432_v24  ;;  %v560_v31 = vmul.f32 %v432_v24, %v432_v24  ;;  %v437_v32 = vadd.f32 %v4227_v12, %v361_v20  ;;  %v363_v33 = vmul.f32 %v4216_v7, %v287_v21 }
  0x78   : > { %499 = vst [vmem:[%s4256_s12 + $0x1a0] sm:$0xff] %v435_v27  ;;  %500 = vst [vmem:[%s4256_s12 + $0x1a8] sm:$0xff] %v436_v28  ;;  %v563_v34 = vmul.f32 %v435_v27, %v435_v27  ;;  %v564_v35 = vmul.f32 %v436_v28, %v436_v28  ;;  %v364_v37 = vmul.f32 %v4219_v8, %v288_v26  ;;  %v4055_v16 = vmov 1966171168  }
  0x79   : > { %v438_v36 = vadd.f32 %v4230_v13, %v362_v29  ;;  %v650_v40 = vadd.f32 %v562_v23, %v561_v17  ;;  %501 = vst [vmem:[%s4256_s12 + $0x1b0] sm:$0xff] %v437_v32  ;;  %v565_v41 = vmul.f32 %v437_v32, %v437_v32  ;;  %v439_v42 = vadd.f32 %v4227_v12, %v363_v33 }
  0x7a   : > { %v365_v43 = vmul.f32 %v4216_v7, %v289_v30  ;;  %645 = vadd.xlane.f32.xlu1 %v644_v6  ;;  %642 = vadd.xlane.f32.xlu0 %v641_v22  ;;  %v647_v46 = vadd.f32 %v560_v31, %v559_v25  ;;  %v440_v48 = vadd.f32 %v4230_v13, %v364_v37  ;;  %v1796_v17 = vunpack.c.l.s4 %v4055_v16 }
  0x7b   : > { %502 = vst [vmem:[%s4256_s12 + $0x1b8] sm:$0xff] %v438_v36  ;;  %v566_v47 = vmul.f32 %v438_v36, %v438_v36  ;;  %v653_v50 = vadd.f32 %v564_v35, %v563_v34  ;;  %503 = vst [vmem:[%s4256_s12 + $0x1c0] sm:$0xff] %v439_v42  ;;  %v366_v51 = vmul.f32 %v4219_v8, %v290_v38  ;;  %v4489_v22 = vsub.s32 2, %v4202_v1 }
  0x7c   : > { %v441_v52 = vadd.f32 %v4227_v12, %v365_v43  ;;  %v367_v53 = vmul.f32 %v4216_v7, %v291_v39  ;;  %504 = vst [vmem:[%s4256_s12 + $0x1c8] sm:$0xff] %v440_v48  ;;  %v567_v55 = vmul.f32 %v439_v42, %v439_v42  ;;  %v368_v56 = vmul.f32 %v4219_v8, %v292_v44 }
  0x7d   : > { %v656_v54 = vadd.f32 %v566_v47, %v565_v41  ;;  %v369_v57 = vmul.f32 %v4216_v7, %v293_v45  ;;  %v568_v58 = vmul.f32 %v440_v48, %v440_v48  ;;  %v442_v59 = vadd.f32 %v4230_v13, %v366_v51 }
  0x7e   : > { %505 = vst [vmem:[%s4256_s12 + $0x1d0] sm:$0xff] %v441_v52  ;;  %v443_v60 = vadd.f32 %v4227_v12, %v367_v53  ;;  %v370_v61 = vmul.f32 %v4219_v8, %v294_v49  ;;  %651 = vadd.xlane.f32.xlu1 %v650_v40  ;;  %648 = vadd.xlane.f32.xlu0 %v647_v46  ;;  %v1797_v19 = vunpack.c.0.s8 %v1796_v17  ;;  %v4492_v23 = vsub.s32 3, %v4202_v1 }
  0x7f   : > { %v569_v62 = vmul.f32 %v441_v52, %v441_v52  ;;  %v444_v63 = vadd.f32 %v4230_v13, %v368_v56  ;;  %v445_v4 = vadd.f32 %v4227_v12, %v369_v57  ;;  %506 = vst [vmem:[%s4256_s12 + $0x1d8] sm:$0xff] %v442_v59  ;;  %v570_v5 = vmul.f32 %v442_v59, %v442_v59 }
  0x80   : > { %507 = vst [vmem:[%s4256_s12 + $0x1e0] sm:$0xff] %v443_v60  ;;  %v446_v7 = vadd.f32 %v4230_v13, %v370_v61  ;;  %v659_v6 = vadd.f32 %v568_v58, %v567_v55  ;;  %v571_v9 = vmul.f32 %v443_v60, %v443_v60  ;;  %v4495_v24 = vsub.s32 4, %v4202_v1 }
  0x81   : > { %508 = vst [vmem:[%s4256_s12 + $0x1e8] sm:$0xff] %v444_v63  ;;  %509 = vst [vmem:[%s4256_s12 + $0x1f0] sm:$0xff] %v445_v4  ;;  %v572_v10 = vmul.f32 %v444_v63, %v444_v63  ;;  %v662_v8 = vadd.f32 %v570_v5, %v569_v62  ;;  %v573_v11 = vmul.f32 %v445_v4, %v445_v4  ;;  %v4498_v25 = vsub.s32 5, %v4202_v1 }
  0x82   : > { %510 = vst [vmem:[%s4256_s12 + $0x1f8] sm:$0xff] %v446_v7  ;;  %654 = vadd.xlane.f32.xlu0 %v653_v50  ;;  %657 = vadd.xlane.f32.xlu1 %v656_v54  ;;  %v574_v14 = vmul.f32 %v446_v7, %v446_v7  ;;  %v4501_v27 = vsub.s32 6, %v4202_v1  ;;  %v4504_v28 = vsub.s32 7, %v4202_v1  ;;  %v4509_v32 = vsub.s32 %v1797_v19, %v4202_v1 }
  0x83   : > { %v665_v15 = vadd.f32 %v572_v10, %v571_v9 }
  0x84   : > { %v668_v12 = vadd.f32 %v574_v14, %v573_v11 }
  0x86   : > { %660 = vadd.xlane.f32.xlu0 %v659_v6  ;;  %663 = vadd.xlane.f32.xlu1 %v662_v8 }
  0x8a   : > { %666 = vadd.xlane.f32.xlu0 %v665_v15  ;;  %669 = vadd.xlane.f32.xlu1 %v668_v12 }
  0xd7   : > { %v583_v13 = vpop.xlane.xlu1 %582 }
  0xd8   : > { %v577_v18 = vpop.xlane.xlu0 %576  ;;  %v673_v20 = vmul.f32 -0.5, %v583_v13 }
  0xd9   : > { %v671_v21 = vmul.f32 -0.5, %v577_v18 }
  0xda   : > { %v4506_v29 = vadd.f32 -235.24826, %v673_v20 }
  0xdb   : > { %v3816_v26 = vadd.f32 -235.24826, %v671_v21  ;;  %v586_v30 = vpop.xlane.xlu1 %585 }
  0xdc   : > { %v580_v31 = vpop.xlane.xlu0 %579  ;;  %v674_v33 = vmul.f32 -0.5, %v586_v30  ;;  %v834_v50 = vrot.slane %v4506_v29, %v4205_v2 }
  0xdd   : > { %v672_v34 = vmul.f32 -0.5, %v580_v31  ;;  %v770_v35 = vrot.slane %v3816_v26, %v4205_v2  ;;  %v774_v36 = vrot.slane %v3816_v26, %v4208_v3  ;;  %v778_v37 = vrot.slane %v3816_v26, %v4489_v22 }
  0xde   : > { %v782_v38 = vrot.slane %v3816_v26, %v4492_v23  ;;  %v786_v39 = vrot.slane %v3816_v26, %v4495_v24  ;;  %v790_v40 = vrot.slane %v3816_v26, %v4498_v25  ;;  %v4517_v41 = vadd.f32 -235.24826, %v674_v33 }
  0xdf   : > { %v3817_v42 = vadd.f32 -235.24826, %v672_v34  ;;  %v794_v43 = vrot.slane %v3816_v26, %v4501_v27  ;;  %v798_v44 = vrot.slane %v3816_v26, %v4504_v28  ;;  %v1791_v47 = vcombine.low %v770_v35, %v774_v36 }
  0xe0   : > { %v592_v45 = vpop.xlane.xlu1 %591  ;;  %v589_v46 = vpop.xlane.xlu0 %588  ;;  %v1792_v48 = vcombine.low %v778_v37, %v782_v38  ;;  %v1793_v49 = vcombine.low %v786_v39, %v790_v40  ;;  %v838_v34 = vrot.slane %v4506_v29, %v4208_v3 }
  0xe1   : > { %v676_v51 = vmul.f32 -0.5, %v592_v45  ;;  %v675_v52 = vmul.f32 -0.5, %v589_v46  ;;  %v1794_v53 = vcombine.low %v794_v43, %v798_v44  ;;  %v802_v54 = vrot.slane %v3817_v42, %v4205_v2 }
  0xe2   : > { %v1801_v55 = vrot.slane %v1791_v47, %v4509_v32  ;;  %v1808_v56 = vrot.slane %v1792_v48, %v4509_v32  ;;  %v1815_v57 = vrot.slane %v1793_v49, %v4509_v32  ;;  %v806_v58 = vrot.slane %v3817_v42, %v4208_v3 }
  0xe3   : > { %v4528_v59 = vadd.f32 -235.24826, %v676_v51  ;;  %v4530_v60 = vadd.f32 -235.24826, %v675_v52  ;;  %v1822_v61 = vrot.slane %v1794_v53, %v4509_v32  ;;  %v810_v62 = vrot.slane %v3817_v42, %v4489_v22 }
  0xe4   : > { %v598_v63 = vpop.xlane.xlu1 %597  ;;  %v1823_v5 = vcombine.low %v1801_v55, %v1808_v56  ;;  %v814_v7 = vrot.slane %v3817_v42, %v4492_v23  ;;  %v818_v6 = vrot.slane %v3817_v42, %v4495_v24  ;;  %v822_v9 = vrot.slane %v3817_v42, %v4498_v25 }
  0xe5   : > { %v595_v4 = vpop.xlane.xlu0 %594  ;;  %v678_v10 = vmul.f32 -0.5, %v598_v63  ;;  %v1824_v11 = vcombine.low %v1815_v57, %v1822_v61  ;;  %v826_v14 = vrot.slane %v3817_v42, %v4501_v27  ;;  %v830_v12 = vrot.slane %v3817_v42, %v4504_v28 }
  0xe6   : > { %v677_v8 = vmul.f32 -0.5, %v595_v4  ;;  %v1831_v15 = vrot.slane %v1823_v5, %v4509_v32  ;;  %v1840_v16 = vcombine.low %v802_v54, %v806_v58  ;;  %v1841_v17 = vcombine.low %v810_v62, %v814_v7 }
  0xe7   : > { %v4540_v13 = vadd.f32 -235.24826, %v678_v10  ;;  %v1838_v19 = vrot.slane %v1824_v11, %v4509_v32  ;;  %v1842_v20 = vcombine.low %v818_v6, %v822_v9  ;;  %v1843_v30 = vcombine.low %v826_v14, %v830_v12 }
  0xe8   : > { %v4542_v18 = vadd.f32 -235.24826, %v677_v8  ;;  %v1850_v31 = vrot.slane %v1840_v16, %v4509_v32  ;;  %v1857_v33 = vrot.slane %v1841_v17, %v4509_v32  ;;  %v842_v42 = vrot.slane %v4506_v29, %v4489_v22 }
  0xe9   : > { %v604_v21 = vpop.xlane.xlu1 %603  ;;  %v601_v26 = vpop.xlane.xlu0 %600  ;;  %v1839_v37 = vcombine.low %v1831_v15, %v1838_v19  ;;  %v1864_v38 = vrot.slane %v1842_v20, %v4509_v32  ;;  %v1871_v39 = vrot.slane %v1843_v30, %v4509_v32  ;;  %v846_v43 = vrot.slane %v4506_v29, %v4492_v23 }
  0xea   : > { %v680_v35 = vmul.f32 -0.5, %v604_v21  ;;  %v679_v36 = vmul.f32 -0.5, %v601_v26  ;;  %v1872_v40 = vcombine.low %v1850_v31, %v1857_v33  ;;  %v850_v46 = vrot.slane %v4506_v29, %v4495_v24 }
  0xeb   : > { %3360 = vperm.xlu0 %3919, %v1839_v37   ;;  %v854_v47 = vrot.slane %v4506_v29, %v4498_v25  ;;  %v1873_v51 = vcombine.low %v1864_v38, %v1871_v39  ;;  %v858_v53 = vrot.slane %v4506_v29, %v4501_v27  ;;  %v862_v54 = vrot.slane %v4506_v29, %v4504_v28 }
  0xec   : > { %v4555_v44 = vadd.f32 -235.24826, %v680_v35  ;;  %v4557_v45 = vadd.f32 -235.24826, %v679_v36  ;;  %v1880_v52 = vrot.slane %v1872_v40, %v4509_v32  ;;  %v1889_v57 = vcombine.low %v834_v50, %v838_v34 }
  0xed   : > { %v610_v48 = vpop.xlane.xlu1 %609  ;;  %v607_v49 = vpop.xlane.xlu0 %606  ;;  %v1890_v58 = vcombine.low %v842_v42, %v846_v43  ;;  %v1887_v61 = vrot.slane %v1873_v51, %v4509_v32  ;;  %v1891_v62 = vcombine.low %v850_v46, %v854_v47  ;;  %v1892_v63 = vcombine.low %v858_v53, %v862_v54 }
  0xee   : > { %v682_v55 = vmul.f32 -0.5, %v610_v48  ;;  %v681_v56 = vmul.f32 -0.5, %v607_v49  ;;  %v866_v4 = vrot.slane %v4517_v41, %v4205_v2  ;;  %v1899_v6 = vrot.slane %v1889_v57, %v4509_v32 }
  0xef   : > { %v1906_v9 = vrot.slane %v1890_v58, %v4509_v32  ;;  %v1888_v29 = vcombine.low %v1880_v52, %v1887_v61  ;;  %v1913_v50 = vrot.slane %v1891_v62, %v4509_v32  ;;  %v1920_v11 = vrot.slane %v1892_v63, %v4509_v32 }
  0xf0   : > { %v4571_v5 = vadd.f32 -235.24826, %v682_v55  ;;  %v4573_v7 = vadd.f32 -235.24826, %v681_v56  ;;  %v870_v14 = vrot.slane %v4517_v41, %v4208_v3  ;;  %v874_v17 = vrot.slane %v4517_v41, %v4489_v22 }
  0xf1   : > { %v616_v10 = vpop.xlane.xlu1 %615  ;;  %v613_v8 = vpop.xlane.xlu0 %612  ;;  %v1921_v16 = vcombine.low %v1899_v6, %v1906_v9  ;;  %3363 = vperm.xlu1 %3920, %v1888_v29   ;;  %v1922_v19 = vcombine.low %v1913_v50, %v1920_v11  ;;  %v878_v20 = vrot.slane %v4517_v41, %v4492_v23  ;;  %v882_v21 = vrot.slane %v4517_v41, %v4495_v24 }
  0xf2   : > { %v684_v15 = vmul.f32 -0.5, %v616_v10  ;;  %v683_v12 = vmul.f32 -0.5, %v613_v8  ;;  %v886_v26 = vrot.slane %v4517_v41, %v4498_v25  ;;  %v890_v34 = vrot.slane %v4517_v41, %v4501_v27 }
  0xf3   : > { %v1929_v33 = vrot.slane %v1921_v16, %v4509_v32  ;;  %v1936_v35 = vrot.slane %v1922_v19, %v4509_v32  ;;  %v894_v38 = vrot.slane %v4517_v41, %v4504_v28  ;;  %v1938_v39 = vcombine.low %v866_v4, %v870_v14 }
  0xf4   : > { %v4589_v30 = vadd.f32 -235.24826, %v684_v15  ;;  %v4591_v31 = vadd.f32 -235.24826, %v683_v12  ;;  %v1939_v40 = vcombine.low %v874_v17, %v878_v20  ;;  %v1940_v46 = vcombine.low %v882_v21, %v886_v26 }
  0xf5   : > { %v898_v47 = vrot.slane %v4530_v60, %v4205_v2  ;;  %v1937_v48 = vcombine.low %v1929_v33, %v1936_v35  ;;  %v1941_v49 = vcombine.low %v890_v34, %v894_v38  ;;  %v1948_v51 = vrot.slane %v1938_v39, %v4509_v32 }
  0xf6   : > { %v622_v36 = vpop.xlane.xlu1 %621  ;;  %v619_v37 = vpop.xlane.xlu0 %618  ;;  %v1955_v52 = vrot.slane %v1939_v40, %v4509_v32  ;;  %v1962_v41 = vrot.slane %v1940_v46, %v4509_v32  ;;  %v902_v55 = vrot.slane %v4530_v60, %v4208_v3  ;;  %v906_v62 = vrot.slane %v4530_v60, %v4489_v22 }
  0xf7   : > { %v686_v42 = vmul.f32 -0.5, %v622_v36  ;;  %v685_v43 = vmul.f32 -0.5, %v619_v37  ;;  %3366 = vperm.xlu1 %3920, %v1937_v48   ;;  %v1969_v56 = vrot.slane %v1941_v49, %v4509_v32  ;;  %v910_v63 = vrot.slane %v4530_v60, %v4492_v23 }
  0xf8   : > { %v1970_v57 = vcombine.low %v1948_v51, %v1955_v52  ;;  %v914_v9 = vrot.slane %v4530_v60, %v4495_v24  ;;  %v918_v29 = vrot.slane %v4530_v60, %v4498_v25  ;;  %v922_v50 = vrot.slane %v4530_v60, %v4501_v27 }
  0xf9   : > { %v4603_v53 = vadd.f32 -235.24826, %v686_v42  ;;  %v4605_v54 = vadd.f32 -235.24826, %v685_v43  ;;  %v1971_v10 = vcombine.low %v1962_v41, %v1969_v56  ;;  %v926_v11 = vrot.slane %v4530_v60, %v4504_v28 }
  0xfa   : > { %v628_v58 = vpop.xlane.xlu1 %627  ;;  %v625_v61 = vpop.xlane.xlu0 %624  ;;  %v1978_v8 = vrot.slane %v1970_v57, %v4509_v32  ;;  %v1987_v12 = vcombine.low %v898_v47, %v902_v55  ;;  %v1988_v16 = vcombine.low %v906_v62, %v910_v63  ;;  %v1989_v19 = vcombine.low %v914_v9, %v918_v29 }
  0xfb   : > { %v688_v4 = vmul.f32 -0.5, %v628_v58  ;;  %v687_v6 = vmul.f32 -0.5, %v625_v61  ;;  %v1985_v17 = vrot.slane %v1971_v10, %v4509_v32  ;;  %v1990_v20 = vcombine.low %v922_v50, %v926_v11 }
  0xfc   : > { %v1058_v33 = vrot.slane %v4555_v44, %v4205_v2  ;;  %v1997_v34 = vrot.slane %v1987_v12, %v4509_v32  ;;  %v2004_v35 = vrot.slane %v1988_v16, %v4509_v32  ;;  %v2011_v38 = vrot.slane %v1989_v19, %v4509_v32 }
  0xfd   : > { %v4624_v14 = vadd.f32 -235.24826, %v688_v4  ;;  %v4626_v15 = vadd.f32 -235.24826, %v687_v6  ;;  %v1986_v37 = vcombine.low %v1978_v8, %v1985_v17  ;;  %v2018_v39 = vrot.slane %v1990_v20, %v4509_v32 }
  0xfe   : > { %v1062_v40 = vrot.slane %v4555_v44, %v4208_v3  ;;  %v2019_v42 = vcombine.low %v1997_v34, %v2004_v35  ;;  %v1066_v47 = vrot.slane %v4555_v44, %v4489_v22  ;;  %v1070_v49 = vrot.slane %v4555_v44, %v4492_v23 }
  0xff   : > { %v634_v21 = vpop.xlane.xlu1 %633  ;;  %v631_v26 = vpop.xlane.xlu0 %630  ;;  %3369 = vperm.xlu1 %3920, %v1986_v37   ;;  %v2020_v48 = vcombine.low %v2011_v38, %v2018_v39  ;;  %v1074_v51 = vrot.slane %v4555_v44, %v4495_v24  ;;  %v1078_v52 = vrot.slane %v4555_v44, %v4498_v25  ;;  %v1082_v55 = vrot.slane %v4555_v44, %v4501_v27 }
 0x100   : > { %v690_v60 = vmul.f32 -0.5, %v634_v21  ;;  %v689_v36 = vmul.f32 -0.5, %v631_v26  ;;  %v2027_v41 = vrot.slane %v2019_v42, %v4509_v32  ;;  %v1086_v56 = vrot.slane %v4555_v44, %v4504_v28 }
 0x101   : > { %v2232_v57 = vcombine.low %v1058_v33, %v1062_v40  ;;  %v2034_v58 = vrot.slane %v2020_v48, %v4509_v32  ;;  %v2233_v61 = vcombine.low %v1066_v47, %v1070_v49  ;;  %v2234_v62 = vcombine.low %v1074_v51, %v1078_v52 }
 0x102   : > { %v4637_v43 = vadd.f32 -235.24826, %v690_v60  ;;  %v4639_v46 = vadd.f32 -235.24826, %v689_v36  ;;  %v930_v63 = vrot.slane %v4528_v59, %v4205_v2  ;;  %v2235_v4 = vcombine.low %v1082_v55, %v1086_v56 }
 0x103   : > { %v2242_v6 = vrot.slane %v2232_v57, %v4509_v32  ;;  %v934_v9 = vrot.slane %v4528_v59, %v4208_v3  ;;  %v938_v29 = vrot.slane %v4528_v59, %v4489_v22  ;;  %v2035_v10 = vcombine.low %v2027_v41, %v2034_v58  ;;  %v640_v11 = vpop.xlane.xlu1 %639  ;;  %v637_v34 = vpop.xlane.xlu0 %636 }
 0x104   : > { %v2249_v44 = vrot.slane %v2233_v61, %v4509_v32  ;;  %v2256_v8 = vrot.slane %v2234_v62, %v4509_v32  ;;  %v942_v50 = vrot.slane %v4528_v59, %v4492_v23  ;;  %v2263_v12 = vrot.slane %v2235_v4, %v4509_v32 }
 0x105   : > { %v946_v16 = vrot.slane %v4528_v59, %v4495_v24  ;;  %v950_v17 = vrot.slane %v4528_v59, %v4498_v25  ;;  %v954_v19 = vrot.slane %v4528_v59, %v4501_v27  ;;  %3372 = vperm.xlu1 %3920, %v2035_v10   ;;  %v958_v21 = vrot.slane %v4528_v59, %v4504_v28 }
 0x106   : > { %v2264_v20 = vcombine.low %v2242_v6, %v2249_v44  ;;  %v2036_v26 = vcombine.low %v930_v63, %v934_v9  ;;  %v2037_v33 = vcombine.low %v938_v29, %v942_v50  ;;  %v2265_v35 = vcombine.low %v2256_v8, %v2263_v12 }
 0x107   : > { %v2038_v60 = vcombine.low %v946_v16, %v950_v17  ;;  %v692_v36 = vmul.f32 -0.5, %v640_v11  ;;  %v691_v37 = vmul.f32 -0.5, %v637_v34  ;;  %v2039_v39 = vcombine.low %v954_v19, %v958_v21  ;;  %v646_v56 = vpop.xlane.xlu1 %645  ;;  %v643_v50 = vpop.xlane.xlu0 %642 }
 0x108   : > { %v2272_v38 = vrot.slane %v2264_v20, %v4509_v32  ;;  %v2046_v40 = vrot.slane %v2036_v26, %v4509_v32  ;;  %v2053_v42 = vrot.slane %v2037_v33, %v4509_v32  ;;  %v2279_v47 = vrot.slane %v2265_v35, %v4509_v32 }
 0x109   : > { %v2060_v48 = vrot.slane %v2038_v60, %v4509_v32  ;;  %v4680_v49 = vadd.f32 -235.24826, %v692_v36  ;;  %v4682_v59 = vadd.f32 -235.24826, %v691_v37  ;;  %v2067_v51 = vrot.slane %v2039_v39, %v4509_v32 }
 0x10a   : > { %v2068_v52 = vcombine.low %v2046_v40, %v2053_v42  ;;  %v962_v41 = vrot.slane %v4542_v18, %v4205_v2  ;;  %v966_v55 = vrot.slane %v4542_v18, %v4208_v3  ;;  %v2280_v57 = vcombine.low %v2272_v38, %v2279_v47 }
 0x10b   : > { %v970_v58 = vrot.slane %v4542_v18, %v4489_v22  ;;  %v974_v61 = vrot.slane %v4542_v18, %v4492_v23  ;;  %v978_v62 = vrot.slane %v4542_v18, %v4495_v24  ;;  %v2069_v63 = vcombine.low %v2060_v48, %v2067_v51  ;;  %v652_v39 = vpop.xlane.xlu1 %651 }
 0x10c   : > { %v2076_v4 = vrot.slane %v2068_v52, %v4509_v32  ;;  %v982_v6 = vrot.slane %v4542_v18, %v4498_v25  ;;  %v986_v9 = vrot.slane %v4542_v18, %v4501_v27  ;;  %3387 = vperm.xlu0 %3919, %v2280_v57   ;;  %v990_v29 = vrot.slane %v4542_v18, %v4504_v28 }
 0x10d   : > { %v2085_v10 = vcombine.low %v962_v41, %v966_v55  ;;  %v2086_v44 = vcombine.low %v970_v58, %v974_v61  ;;  %v694_v8 = vmul.f32 -0.5, %v646_v56  ;;  %v2083_v11 = vrot.slane %v2069_v63, %v4509_v32  ;;  %v649_v56 = vpop.xlane.xlu0 %648 }
 0x10e   : > { %v2087_v12 = vcombine.low %v978_v62, %v982_v6  ;;  %v693_v16 = vmul.f32 -0.5, %v643_v50  ;;  %v994_v17 = vrot.slane %v4540_v13, %v4205_v2  ;;  %v2088_v19 = vcombine.low %v986_v9, %v990_v29 }
 0x10f   : > { %v2095_v20 = vrot.slane %v2085_v10, %v4509_v32  ;;  %v2102_v21 = vrot.slane %v2086_v44, %v4509_v32  ;;  %v4707_v26 = vadd.f32 -235.24826, %v694_v8  ;;  %v2084_v33 = vcombine.low %v2076_v4, %v2083_v11 }
 0x110   : > { %v2109_v18 = vrot.slane %v2087_v12, %v4509_v32  ;;  %v4710_v34 = vadd.f32 -235.24826, %v693_v16  ;;  %v998_v35 = vrot.slane %v4540_v13, %v4208_v3  ;;  %v2116_v60 = vrot.slane %v2088_v19, %v4509_v32 }
 0x111   : > { %v2117_v36 = vcombine.low %v2095_v20, %v2102_v21  ;;  %v1002_v37 = vrot.slane %v4540_v13, %v4489_v22  ;;  %v1006_v38 = vrot.slane %v4540_v13, %v4492_v23  ;;  %3375 = vperm.xlu1 %3920, %v2084_v33   ;;  %v1010_v40 = vrot.slane %v4540_v13, %v4495_v24 }
 0x112   : > { %v1014_v42 = vrot.slane %v4540_v13, %v4498_v25  ;;  %v1018_v47 = vrot.slane %v4540_v13, %v4501_v27  ;;  %v1022_v48 = vrot.slane %v4540_v13, %v4504_v28  ;;  %v2118_v51 = vcombine.low %v2109_v18, %v2116_v60 }
 0x113   : > { %v2125_v52 = vrot.slane %v2117_v36, %v4509_v32  ;;  %v2134_v41 = vcombine.low %v994_v17, %v998_v35  ;;  %v2135_v55 = vcombine.low %v1002_v37, %v1006_v38  ;;  %v696_v61 = vmul.f32 -0.5, %v652_v39 }
 0x114   : > { %v2136_v57 = vcombine.low %v1010_v40, %v1014_v42  ;;  %v2137_v58 = vcombine.low %v1018_v47, %v1022_v48  ;;  %v695_v62 = vmul.f32 -0.5, %v649_v56  ;;  %v2132_v63 = vrot.slane %v2118_v51, %v4509_v32 }
 0x115   : > { %v2144_v4 = vrot.slane %v2134_v41, %v4509_v32  ;;  %v2151_v6 = vrot.slane %v2135_v55, %v4509_v32  ;;  %v1314_v9 = vrot.slane %v4624_v14, %v4205_v2  ;;  %v4735_v10 = vadd.f32 -235.24826, %v696_v61  ;;  %v655_v41 = vpop.xlane.xlu0 %654 }
 0x116   : > { %v2158_v13 = vrot.slane %v2136_v57, %v4509_v32  ;;  %v2165_v29 = vrot.slane %v2137_v58, %v4509_v32  ;;  %v4737_v44 = vadd.f32 -235.24826, %v695_v62  ;;  %v2133_v8 = vcombine.low %v2125_v52, %v2132_v63 }
 0x117   : > { %v2166_v50 = vcombine.low %v2144_v4, %v2151_v6  ;;  %v1318_v11 = vrot.slane %v4624_v14, %v4208_v3  ;;  %v1322_v12 = vrot.slane %v4624_v14, %v4489_v22  ;;  %v1326_v17 = vrot.slane %v4624_v14, %v4492_v23 }
 0x118   : > { %v2167_v16 = vcombine.low %v2158_v13, %v2165_v29  ;;  %v1330_v19 = vrot.slane %v4624_v14, %v4495_v24  ;;  %v1334_v20 = vrot.slane %v4624_v14, %v4498_v25  ;;  %3378 = vperm.xlu1 %3920, %v2133_v8   ;;  %v1338_v33 = vrot.slane %v4624_v14, %v4501_v27 }
 0x119   : > { %v2174_v21 = vrot.slane %v2166_v50, %v4509_v32  ;;  %v1342_v18 = vrot.slane %v4624_v14, %v4504_v28  ;;  %v2624_v35 = vcombine.low %v1314_v9, %v1318_v11  ;;  %v2625_v36 = vcombine.low %v1322_v12, %v1326_v17 }
 0x11a   : > { %v2181_v60 = vrot.slane %v2167_v16, %v4509_v32  ;;  %v2626_v37 = vcombine.low %v1330_v19, %v1334_v20  ;;  %v1026_v38 = vrot.slane %v4557_v45, %v4205_v2  ;;  %v1030_v42 = vrot.slane %v4557_v45, %v4208_v3 }
 0x11b   : > { %v2627_v39 = vcombine.low %v1338_v33, %v1342_v18  ;;  %v2634_v40 = vrot.slane %v2624_v35, %v4509_v32  ;;  %v1034_v47 = vrot.slane %v4557_v45, %v4489_v22  ;;  %v2641_v14 = vrot.slane %v2625_v36, %v4509_v32 }
 0x11c   : > { %v2182_v48 = vcombine.low %v2174_v21, %v2181_v60  ;;  %v2648_v51 = vrot.slane %v2626_v37, %v4509_v32  ;;  %v1038_v52 = vrot.slane %v4557_v45, %v4492_v23  ;;  %v1042_v56 = vrot.slane %v4557_v45, %v4495_v24 }
 0x11d   : > { %v2655_v55 = vrot.slane %v2627_v39, %v4509_v32  ;;  %v1046_v57 = vrot.slane %v4557_v45, %v4498_v25  ;;  %v1050_v58 = vrot.slane %v4557_v45, %v4501_v27  ;;  %v2656_v61 = vcombine.low %v2634_v40, %v2641_v14 }
 0x11e   : > { %3381 = vperm.xlu1 %3920, %v2182_v48   ;;  %v1054_v62 = vrot.slane %v4557_v45, %v4504_v28  ;;  %v2183_v63 = vcombine.low %v1026_v38, %v1030_v42  ;;  %v2184_v4 = vcombine.low %v1034_v47, %v1038_v52  ;;  %v697_v13 = vmul.f32 -0.5, %v655_v41 }
 0x11f   : > { %v2657_v6 = vcombine.low %v2648_v51, %v2655_v55  ;;  %v2185_v9 = vcombine.low %v1042_v56, %v1046_v57  ;;  %v1378_v29 = vrot.slane %v4637_v43, %v4205_v2  ;;  %v2664_v8 = vrot.slane %v2656_v61, %v4509_v32 }
 0x120   : > { %v2186_v50 = vcombine.low %v1050_v58, %v1054_v62  ;;  %v2193_v11 = vrot.slane %v2183_v63, %v4509_v32  ;;  %v2200_v12 = vrot.slane %v2184_v4, %v4509_v32  ;;  %v4782_v45 = vadd.f32 -235.24826, %v697_v13  ;;  %v658_v62 = vpop.xlane.xlu1 %657 }
 0x121   : > { %v2671_v16 = vrot.slane %v2657_v6, %v4509_v32  ;;  %v2207_v17 = vrot.slane %v2185_v9, %v4509_v32  ;;  %v1382_v19 = vrot.slane %v4637_v43, %v4208_v3  ;;  %v1386_v33 = vrot.slane %v4637_v43, %v4489_v22 }
 0x122   : > { %v2214_v20 = vrot.slane %v2186_v50, %v4509_v32  ;;  %v2215_v21 = vcombine.low %v2193_v11, %v2200_v12  ;;  %v1390_v18 = vrot.slane %v4637_v43, %v4492_v23  ;;  %v1394_v60 = vrot.slane %v4637_v43, %v4495_v24 }
 0x123   : > { %v2672_v35 = vcombine.low %v2664_v8, %v2671_v16  ;;  %v1398_v36 = vrot.slane %v4637_v43, %v4498_v25  ;;  %v1402_v37 = vrot.slane %v4637_v43, %v4501_v27  ;;  %v1406_v40 = vrot.slane %v4637_v43, %v4504_v28 }
 0x124   : > { %v2216_v38 = vcombine.low %v2207_v17, %v2214_v20  ;;  %v2223_v39 = vrot.slane %v2215_v21, %v4509_v32  ;;  %v2722_v42 = vcombine.low %v1378_v29, %v1382_v19  ;;  %v2723_v47 = vcombine.low %v1386_v33, %v1390_v18 }
 0x125   : > { %3411 = vperm.xlu0 %3919, %v2672_v35   ;;  %v2724_v48 = vcombine.low %v1394_v60, %v1398_v36  ;;  %v1282_v14 = vrot.slane %v4626_v15, %v4205_v2  ;;  %v1286_v51 = vrot.slane %v4626_v15, %v4208_v3  ;;  %v2725_v41 = vcombine.low %v1402_v37, %v1406_v40 }
 0x126   : > { %v2230_v52 = vrot.slane %v2216_v38, %v4509_v32  ;;  %v2732_v55 = vrot.slane %v2722_v42, %v4509_v32  ;;  %v1290_v56 = vrot.slane %v4626_v15, %v4489_v22  ;;  %v2739_v43 = vrot.slane %v2723_v47, %v4509_v32 }
 0x127   : > { %v2746_v57 = vrot.slane %v2724_v48, %v4509_v32  ;;  %v1294_v58 = vrot.slane %v4626_v15, %v4492_v23  ;;  %v1298_v61 = vrot.slane %v4626_v15, %v4495_v24  ;;  %v2753_v4 = vrot.slane %v2725_v41, %v4509_v32 }
 0x128   : > { %v2231_v63 = vcombine.low %v2223_v39, %v2230_v52  ;;  %v1302_v6 = vrot.slane %v4626_v15, %v4498_v25  ;;  %v1306_v9 = vrot.slane %v4626_v15, %v4501_v27  ;;  %v2754_v13 = vcombine.low %v2732_v55, %v2739_v43 }
 0x129   : > { %v1310_v29 = vrot.slane %v4626_v15, %v4504_v28  ;;  %v2575_v8 = vcombine.low %v1282_v14, %v1286_v51  ;;  %v2576_v50 = vcombine.low %v1290_v56, %v1294_v58  ;;  %v2755_v11 = vcombine.low %v2746_v57, %v2753_v4 }
 0x12a   : > { %3384 = vperm.xlu1 %3920, %v2231_v63   ;;  %v2577_v12 = vcombine.low %v1298_v61, %v1302_v6  ;;  %v698_v16 = vmul.f32 -0.5, %v658_v62  ;;  %v1442_v17 = vrot.slane %v4680_v49, %v4205_v2  ;;  %v2762_v19 = vrot.slane %v2754_v13, %v4509_v32  ;;  %v661_v13 = vpop.xlane.xlu0 %660 }
 0x12b   : > { %v2578_v20 = vcombine.low %v1306_v9, %v1310_v29  ;;  %v2585_v21 = vrot.slane %v2575_v8, %v4509_v32  ;;  %v2592_v33 = vrot.slane %v2576_v50, %v4509_v32  ;;  %v2769_v18 = vrot.slane %v2755_v11, %v4509_v32 }
 0x12c   : > { %v2599_v15 = vrot.slane %v2577_v12, %v4509_v32  ;;  %v4828_v35 = vadd.f32 -235.24826, %v698_v16  ;;  %v1446_v60 = vrot.slane %v4680_v49, %v4208_v3  ;;  %v1450_v38 = vrot.slane %v4680_v49, %v4489_v22 }
 0x12d   : > { %v2606_v36 = vrot.slane %v2578_v20, %v4509_v32  ;;  %v2607_v37 = vcombine.low %v2585_v21, %v2592_v33  ;;  %v1454_v39 = vrot.slane %v4680_v49, %v4492_v23  ;;  %v2770_v40 = vcombine.low %v2762_v19, %v2769_v18 }
 0x12e   : > { %v1458_v42 = vrot.slane %v4680_v49, %v4495_v24  ;;  %v1462_v47 = vrot.slane %v4680_v49, %v4498_v25  ;;  %v1466_v48 = vrot.slane %v4680_v49, %v4501_v27  ;;  %v1470_v52 = vrot.slane %v4680_v49, %v4504_v28 }
 0x12f   : > { %v2608_v14 = vcombine.low %v2599_v15, %v2606_v36  ;;  %v2615_v51 = vrot.slane %v2607_v37, %v4509_v32  ;;  %v2820_v41 = vcombine.low %v1442_v17, %v1446_v60  ;;  %3417 = vperm.xlu0 %3919, %v2770_v40   ;;  %v2821_v55 = vcombine.low %v1450_v38, %v1454_v39 }
 0x130   : > { %v2822_v56 = vcombine.low %v1458_v42, %v1462_v47  ;;  %v1346_v43 = vrot.slane %v4639_v46, %v4205_v2  ;;  %v1350_v57 = vrot.slane %v4639_v46, %v4208_v3  ;;  %v2823_v61 = vcombine.low %v1466_v48, %v1470_v52 }
 0x131   : > { %v2622_v58 = vrot.slane %v2608_v14, %v4509_v32  ;;  %v2830_v62 = vrot.slane %v2820_v41, %v4509_v32  ;;  %v1354_v63 = vrot.slane %v4639_v46, %v4489_v22  ;;  %v2837_v49 = vrot.slane %v2821_v55, %v4509_v32 }
 0x132   : > { %v2844_v4 = vrot.slane %v2822_v56, %v4509_v32  ;;  %v1358_v6 = vrot.slane %v4639_v46, %v4492_v23  ;;  %v1362_v9 = vrot.slane %v4639_v46, %v4495_v24  ;;  %v2851_v8 = vrot.slane %v2823_v61, %v4509_v32 }
 0x133   : > { %v2623_v29 = vcombine.low %v2615_v51, %v2622_v58  ;;  %v1366_v50 = vrot.slane %v4639_v46, %v4498_v25  ;;  %v1370_v11 = vrot.slane %v4639_v46, %v4501_v27  ;;  %v2852_v12 = vcombine.low %v2830_v62, %v2837_v49 }
 0x134   : > { %v1374_v16 = vrot.slane %v4639_v46, %v4504_v28  ;;  %v2673_v17 = vcombine.low %v1346_v43, %v1350_v57  ;;  %v2674_v19 = vcombine.low %v1354_v63, %v1358_v6  ;;  %v2853_v20 = vcombine.low %v2844_v4, %v2851_v8 }
 0x135   : > { %3408 = vperm.xlu1 %3920, %v2623_v29   ;;  %v2675_v21 = vcombine.low %v1362_v9, %v1366_v50  ;;  %v699_v33 = vmul.f32 -0.5, %v661_v13  ;;  %v1506_v18 = vrot.slane %v4707_v26, %v4205_v2  ;;  %v2860_v15 = vrot.slane %v2852_v12, %v4509_v32 }
 0x136   : > { %v2676_v60 = vcombine.low %v1370_v11, %v1374_v16  ;;  %v2683_v36 = vrot.slane %v2673_v17, %v4509_v32  ;;  %v2690_v37 = vrot.slane %v2674_v19, %v4509_v32  ;;  %v2867_v38 = vrot.slane %v2853_v20, %v4509_v32  ;;  %v664_v11 = vpop.xlane.xlu1 %663 }
 0x137   : > { %v2697_v46 = vrot.slane %v2675_v21, %v4509_v32  ;;  %v4874_v39 = vadd.f32 -235.24826, %v699_v33  ;;  %v1510_v40 = vrot.slane %v4707_v26, %v4208_v3  ;;  %v1514_v48 = vrot.slane %v4707_v26, %v4489_v22 }
 0x138   : > { %v2704_v42 = vrot.slane %v2676_v60, %v4509_v32  ;;  %v2705_v47 = vcombine.low %v2683_v36, %v2690_v37  ;;  %v1518_v14 = vrot.slane %v4707_v26, %v4492_v23  ;;  %v2868_v51 = vcombine.low %v2860_v15, %v2867_v38 }
 0x139   : > { %v1522_v52 = vrot.slane %v4707_v26, %v4495_v24  ;;  %v1526_v41 = vrot.slane %v4707_v26, %v4498_v25  ;;  %v1530_v55 = vrot.slane %v4707_v26, %v4501_v27  ;;  %v1534_v57 = vrot.slane %v4707_v26, %v4504_v28 }
 0x13a   : > { %v2706_v56 = vcombine.low %v2697_v46, %v2704_v42  ;;  %v2713_v43 = vrot.slane %v2705_v47, %v4509_v32  ;;  %v2918_v58 = vcombine.low %v1506_v18, %v1510_v40  ;;  %3423 = vperm.xlu0 %3919, %v2868_v51   ;;  %v2919_v61 = vcombine.low %v1514_v48, %v1518_v14 }
 0x13b   : > { %v2920_v62 = vcombine.low %v1522_v52, %v1526_v41  ;;  %v1410_v63 = vrot.slane %v4682_v59, %v4205_v2  ;;  %v1414_v49 = vrot.slane %v4682_v59, %v4208_v3  ;;  %v2921_v6 = vcombine.low %v1530_v55, %v1534_v57 }
 0x13c   : > { %v2720_v4 = vrot.slane %v2706_v56, %v4509_v32  ;;  %v2928_v9 = vrot.slane %v2918_v58, %v4509_v32  ;;  %v1418_v13 = vrot.slane %v4682_v59, %v4489_v22  ;;  %v2935_v26 = vrot.slane %v2919_v61, %v4509_v32 }
 0x13d   : > { %v2942_v29 = vrot.slane %v2920_v62, %v4509_v32  ;;  %v1422_v8 = vrot.slane %v4682_v59, %v4492_v23  ;;  %v1426_v50 = vrot.slane %v4682_v59, %v4495_v24  ;;  %v2949_v16 = vrot.slane %v2921_v6, %v4509_v32 }
 0x13e   : > { %v2721_v12 = vcombine.low %v2713_v43, %v2720_v4  ;;  %v1430_v17 = vrot.slane %v4682_v59, %v4498_v25  ;;  %v1434_v19 = vrot.slane %v4682_v59, %v4501_v27  ;;  %v2950_v20 = vcombine.low %v2928_v9, %v2935_v26 }
 0x13f   : > { %v1438_v21 = vrot.slane %v4682_v59, %v4504_v28  ;;  %v2771_v33 = vcombine.low %v1410_v63, %v1414_v49  ;;  %v2772_v18 = vcombine.low %v1418_v13, %v1422_v8  ;;  %v2951_v15 = vcombine.low %v2942_v29, %v2949_v16 }
 0x140   : > { %3414 = vperm.xlu1 %3920, %v2721_v12   ;;  %v2773_v60 = vcombine.low %v1426_v50, %v1430_v17  ;;  %v700_v36 = vmul.f32 -0.5, %v664_v11  ;;  %v1570_v37 = vrot.slane %v4735_v10, %v4205_v2  ;;  %v2958_v38 = vrot.slane %v2950_v20, %v4509_v32  ;;  %v667_v17 = vpop.xlane.xlu0 %666 }
 0x141   : > { %v2774_v46 = vcombine.low %v1434_v19, %v1438_v21  ;;  %v2781_v40 = vrot.slane %v2771_v33, %v4509_v32  ;;  %v2788_v42 = vrot.slane %v2772_v18, %v4509_v32  ;;  %v2965_v47 = vrot.slane %v2951_v15, %v4509_v32 }
 0x142   : > { %v2795_v59 = vrot.slane %v2773_v60, %v4509_v32  ;;  %v4920_v48 = vadd.f32 -235.24826, %v700_v36  ;;  %v1574_v14 = vrot.slane %v4735_v10, %v4208_v3  ;;  %v1578_v41 = vrot.slane %v4735_v10, %v4489_v22 }
 0x143   : > { %v2802_v51 = vrot.slane %v2774_v46, %v4509_v32  ;;  %v2803_v52 = vcombine.low %v2781_v40, %v2788_v42  ;;  %v1582_v55 = vrot.slane %v4735_v10, %v4492_v23  ;;  %v2966_v56 = vcombine.low %v2958_v38, %v2965_v47 }
 0x144   : > { %v1586_v43 = vrot.slane %v4735_v10, %v4495_v24  ;;  %v1590_v57 = vrot.slane %v4735_v10, %v4498_v25  ;;  %v1594_v58 = vrot.slane %v4735_v10, %v4501_v27  ;;  %v1598_v63 = vrot.slane %v4735_v10, %v4504_v28 }
 0x145   : > { %v2804_v61 = vcombine.low %v2795_v59, %v2802_v51  ;;  %v2811_v62 = vrot.slane %v2803_v52, %v4509_v32  ;;  %v3016_v49 = vcombine.low %v1570_v37, %v1574_v14  ;;  %3429 = vperm.xlu0 %3919, %v2966_v56   ;;  %v3017_v4 = vcombine.low %v1578_v41, %v1582_v55 }
 0x146   : > { %v3018_v6 = vcombine.low %v1586_v43, %v1590_v57  ;;  %v1474_v9 = vrot.slane %v4710_v34, %v4205_v2  ;;  %v1478_v13 = vrot.slane %v4710_v34, %v4208_v3  ;;  %v3019_v29 = vcombine.low %v1594_v58, %v1598_v63 }
 0x147   : > { %v2818_v26 = vrot.slane %v2804_v61, %v4509_v32  ;;  %v3026_v8 = vrot.slane %v3016_v49, %v4509_v32  ;;  %v1482_v50 = vrot.slane %v4710_v34, %v4489_v22  ;;  %v3033_v10 = vrot.slane %v3017_v4, %v4509_v32 }
 0x148   : > { %v3040_v11 = vrot.slane %v3018_v6, %v4509_v32  ;;  %v1486_v12 = vrot.slane %v4710_v34, %v4492_v23  ;;  %v1490_v16 = vrot.slane %v4710_v34, %v4495_v24  ;;  %v3047_v20 = vrot.slane %v3019_v29, %v4509_v32 }
 0x149   : > { %v2819_v19 = vcombine.low %v2811_v62, %v2818_v26  ;;  %v1494_v21 = vrot.slane %v4710_v34, %v4498_v25  ;;  %v1498_v33 = vrot.slane %v4710_v34, %v4501_v27  ;;  %v3048_v18 = vcombine.low %v3026_v8, %v3033_v10 }
 0x14a   : > { %v1502_v15 = vrot.slane %v4710_v34, %v4504_v28  ;;  %v2869_v60 = vcombine.low %v1474_v9, %v1478_v13  ;;  %v2870_v36 = vcombine.low %v1482_v50, %v1486_v12  ;;  %v3049_v37 = vcombine.low %v3040_v11, %v3047_v20  ;;  %v670_v20 = vpop.xlane.xlu1 %669 }
 0x14b   : > { %3420 = vperm.xlu1 %3920, %v2819_v19   ;;  %v2871_v38 = vcombine.low %v1490_v16, %v1494_v21  ;;  %v701_v46 = vmul.f32 -0.5, %v667_v17  ;;  %v1538_v40 = vrot.slane %v4737_v44, %v4205_v2  ;;  %v3056_v42 = vrot.slane %v3048_v18, %v4509_v32 }
 0x14c   : > { %v2872_v47 = vcombine.low %v1498_v33, %v1502_v15  ;;  %v2879_v59 = vrot.slane %v2869_v60, %v4509_v32  ;;  %v2886_v14 = vrot.slane %v2870_v36, %v4509_v32  ;;  %v3063_v51 = vrot.slane %v3049_v37, %v4509_v32 }
 0x14d   : > { %v2893_v34 = vrot.slane %v2871_v38, %v4509_v32  ;;  %v4966_v52 = vadd.f32 -235.24826, %v701_v46  ;;  %v1542_v41 = vrot.slane %v4737_v44, %v4208_v3  ;;  %v1546_v43 = vrot.slane %v4737_v44, %v4489_v22 }
 0x14e   : > { %v2900_v55 = vrot.slane %v2872_v47, %v4509_v32  ;;  %v2901_v56 = vcombine.low %v2879_v59, %v2886_v14  ;;  %v1550_v57 = vrot.slane %v4737_v44, %v4492_v23  ;;  %v3064_v58 = vcombine.low %v3056_v42, %v3063_v51 }
 0x14f   : > { %v1554_v61 = vrot.slane %v4737_v44, %v4495_v24  ;;  %v1558_v62 = vrot.slane %v4737_v44, %v4498_v25  ;;  %v1562_v63 = vrot.slane %v4737_v44, %v4501_v27  ;;  %v1566_v6 = vrot.slane %v4737_v44, %v4504_v28 }
 0x150   : > { %v2902_v49 = vcombine.low %v2893_v34, %v2900_v55  ;;  %v2909_v4 = vrot.slane %v2901_v56, %v4509_v32  ;;  %v2967_v9 = vcombine.low %v1538_v40, %v1542_v41  ;;  %3435 = vperm.xlu0 %3919, %v3064_v58   ;;  %v2968_v13 = vcombine.low %v1546_v43, %v1550_v57 }
 0x151   : > { %v2969_v26 = vcombine.low %v1554_v61, %v1558_v62  ;;  %v1602_v29 = vrot.slane %v4782_v45, %v4205_v2  ;;  %v1606_v8 = vrot.slane %v4782_v45, %v4208_v3  ;;  %v2970_v10 = vcombine.low %v1562_v63, %v1566_v6 }
 0x152   : > { %v2916_v50 = vrot.slane %v2902_v49, %v4509_v32  ;;  %v2977_v11 = vrot.slane %v2967_v9, %v4509_v32  ;;  %v1610_v12 = vrot.slane %v4782_v45, %v4489_v22  ;;  %v2984_v44 = vrot.slane %v2968_v13, %v4509_v32 }
 0x153   : > { %v2991_v16 = vrot.slane %v2969_v26, %v4509_v32  ;;  %v1614_v17 = vrot.slane %v4782_v45, %v4492_v23  ;;  %v1618_v19 = vrot.slane %v4782_v45, %v4495_v24  ;;  %v2998_v33 = vrot.slane %v2970_v10, %v4509_v32 }
 0x154   : > { %v2917_v21 = vcombine.low %v2909_v4, %v2916_v50  ;;  %v1622_v18 = vrot.slane %v4782_v45, %v4498_v25  ;;  %v1626_v15 = vrot.slane %v4782_v45, %v4501_v27  ;;  %v2999_v60 = vcombine.low %v2977_v11, %v2984_v44 }
 0x155   : > { %v1630_v36 = vrot.slane %v4782_v45, %v4504_v28  ;;  %v3065_v37 = vcombine.low %v1602_v29, %v1606_v8  ;;  %v3066_v38 = vcombine.low %v1610_v12, %v1614_v17  ;;  %v3000_v46 = vcombine.low %v2991_v16, %v2998_v33 }
 0x156   : > { %3426 = vperm.xlu1 %3920, %v2917_v21   ;;  %v3067_v40 = vcombine.low %v1618_v19, %v1622_v18  ;;  %v702_v42 = vmul.f32 -0.5, %v670_v20  ;;  %v1090_v47 = vrot.slane %v4573_v7, %v4205_v2  ;;  %v3007_v59 = vrot.slane %v2999_v60, %v4509_v32 }
 0x157   : > { %v3068_v14 = vcombine.low %v1626_v15, %v1630_v36  ;;  %v3075_v51 = vrot.slane %v3065_v37, %v4509_v32  ;;  %v3082_v34 = vrot.slane %v3066_v38, %v4509_v32  ;;  %v3014_v41 = vrot.slane %v3000_v46, %v4509_v32 }
 0x158   : > { %v3089_v45 = vrot.slane %v3067_v40, %v4509_v32  ;;  %v5012_v55 = vadd.f32 -235.24826, %v702_v42  ;;  %v1094_v56 = vrot.slane %v4573_v7, %v4208_v3  ;;  %v1098_v58 = vrot.slane %v4573_v7, %v4489_v22 }
 0x159   : > { %v3096_v43 = vrot.slane %v3068_v14, %v4509_v32  ;;  %v3097_v57 = vcombine.low %v3075_v51, %v3082_v34  ;;  %v1102_v61 = vrot.slane %v4573_v7, %v4492_v23  ;;  %v3015_v62 = vcombine.low %v3007_v59, %v3014_v41 }
 0x15a   : > { %v1106_v63 = vrot.slane %v4573_v7, %v4495_v24  ;;  %v1110_v49 = vrot.slane %v4573_v7, %v4498_v25  ;;  %v1114_v4 = vrot.slane %v4573_v7, %v4501_v27  ;;  %v1118_v13 = vrot.slane %v4573_v7, %v4504_v28 }
 0x15b   : > { %v3098_v6 = vcombine.low %v3089_v45, %v3096_v43  ;;  %v3105_v9 = vrot.slane %v3097_v57, %v4509_v32  ;;  %v2281_v26 = vcombine.low %v1090_v47, %v1094_v56  ;;  %3432 = vperm.xlu1 %3920, %v3015_v62   ;;  %v2282_v29 = vcombine.low %v1098_v58, %v1102_v61 }
 0x15c   : > { %v2283_v8 = vcombine.low %v1106_v63, %v1110_v49  ;;  %v1634_v50 = vrot.slane %v4828_v35, %v4205_v2  ;;  %v1638_v10 = vrot.slane %v4828_v35, %v4208_v3  ;;  %v2284_v12 = vcombine.low %v1114_v4, %v1118_v13 }
 0x15d   : > { %v3112_v11 = vrot.slane %v3098_v6, %v4509_v32  ;;  %v2291_v44 = vrot.slane %v2281_v26, %v4509_v32  ;;  %v1642_v16 = vrot.slane %v4828_v35, %v4489_v22  ;;  %v2298_v7 = vrot.slane %v2282_v29, %v4509_v32 }
 0x15e   : > { %v2305_v17 = vrot.slane %v2283_v8, %v4509_v32  ;;  %v1646_v19 = vrot.slane %v4828_v35, %v4492_v23  ;;  %v1650_v20 = vrot.slane %v4828_v35, %v4495_v24  ;;  %v2312_v33 = vrot.slane %v2284_v12, %v4509_v32 }
 0x15f   : > { %v3113_v21 = vcombine.low %v3105_v9, %v3112_v11  ;;  %v1654_v18 = vrot.slane %v4828_v35, %v4498_v25  ;;  %v1658_v15 = vrot.slane %v4828_v35, %v4501_v27  ;;  %v2313_v60 = vcombine.low %v2291_v44, %v2298_v7 }
 0x160   : > { %v1662_v36 = vrot.slane %v4828_v35, %v4504_v28  ;;  %v3114_v37 = vcombine.low %v1634_v50, %v1638_v10  ;;  %v3115_v38 = vcombine.low %v1642_v16, %v1646_v19  ;;  %v2314_v46 = vcombine.low %v2305_v17, %v2312_v33 }
 0x161   : > { %3438 = vperm.xlu0 %3919, %v3113_v21   ;;  %v3116_v40 = vcombine.low %v1650_v20, %v1654_v18  ;;  %v1122_v42 = vrot.slane %v4571_v5, %v4205_v2  ;;  %v1126_v47 = vrot.slane %v4571_v5, %v4208_v3  ;;  %v2321_v59 = vrot.slane %v2313_v60, %v4509_v32 }
 0x162   : > { %v3117_v14 = vcombine.low %v1658_v15, %v1662_v36  ;;  %v3124_v51 = vrot.slane %v3114_v37, %v4509_v32  ;;  %v3131_v34 = vrot.slane %v3115_v38, %v4509_v32  ;;  %v2328_v35 = vrot.slane %v2314_v46, %v4509_v32 }
 0x163   : > { %v3138_v41 = vrot.slane %v3116_v40, %v4509_v32  ;;  %v1130_v45 = vrot.slane %v4571_v5, %v4489_v22  ;;  %v1134_v56 = vrot.slane %v4571_v5, %v4492_v23  ;;  %v1138_v58 = vrot.slane %v4571_v5, %v4495_v24 }
 0x164   : > { %v3145_v43 = vrot.slane %v3117_v14, %v4509_v32  ;;  %v3146_v57 = vcombine.low %v3124_v51, %v3131_v34  ;;  %v1142_v61 = vrot.slane %v4571_v5, %v4498_v25  ;;  %v2329_v62 = vcombine.low %v2321_v59, %v2328_v35 }
 0x165   : > { %v1146_v63 = vrot.slane %v4571_v5, %v4501_v27  ;;  %v1150_v49 = vrot.slane %v4571_v5, %v4504_v28  ;;  %v2330_v4 = vcombine.low %v1122_v42, %v1126_v47  ;;  %v2331_v13 = vcombine.low %v1130_v45, %v1134_v56 }
 0x166   : > { %v3147_v6 = vcombine.low %v3138_v41, %v3145_v43  ;;  %v3154_v9 = vrot.slane %v3146_v57, %v4509_v32  ;;  %v2332_v26 = vcombine.low %v1138_v58, %v1142_v61  ;;  %3390 = vperm.xlu1 %3920, %v2329_v62   ;;  %v1666_v50 = vrot.slane %v4874_v39, %v4205_v2 }
 0x167   : > { %v2333_v29 = vcombine.low %v1146_v63, %v1150_v49  ;;  %v2340_v8 = vrot.slane %v2330_v4, %v4509_v32  ;;  %v1670_v10 = vrot.slane %v4874_v39, %v4208_v3  ;;  %v2347_v5 = vrot.slane %v2331_v13, %v4509_v32 }
 0x168   : > { %v3161_v11 = vrot.slane %v3147_v6, %v4509_v32  ;;  %v2354_v12 = vrot.slane %v2332_v26, %v4509_v32  ;;  %v1674_v44 = vrot.slane %v4874_v39, %v4489_v22  ;;  %v1678_v7 = vrot.slane %v4874_v39, %v4492_v23 }
 0x169   : > { %v2361_v16 = vrot.slane %v2333_v29, %v4509_v32  ;;  %v1682_v17 = vrot.slane %v4874_v39, %v4495_v24  ;;  %v1686_v19 = vrot.slane %v4874_v39, %v4498_v25  ;;  %v2362_v21 = vcombine.low %v2340_v8, %v2347_v5 }
 0x16a   : > { %v3162_v20 = vcombine.low %v3154_v9, %v3161_v11  ;;  %v1690_v33 = vrot.slane %v4874_v39, %v4501_v27  ;;  %v1694_v18 = vrot.slane %v4874_v39, %v4504_v28  ;;  %v3163_v60 = vcombine.low %v1666_v50, %v1670_v10 }
 0x16b   : > { %v2363_v15 = vcombine.low %v2354_v12, %v2361_v16  ;;  %v3164_v36 = vcombine.low %v1674_v44, %v1678_v7  ;;  %v3165_v37 = vcombine.low %v1682_v17, %v1686_v19  ;;  %v2370_v38 = vrot.slane %v2362_v21, %v4509_v32 }
 0x16c   : > { %3441 = vperm.xlu0 %3919, %v3162_v20   ;;  %v3166_v46 = vcombine.low %v1690_v33, %v1694_v18  ;;  %v1154_v40 = vrot.slane %v4591_v31, %v4205_v2  ;;  %v1158_v42 = vrot.slane %v4591_v31, %v4208_v3  ;;  %v3173_v59 = vrot.slane %v3163_v60, %v4509_v32 }
 0x16d   : > { %v2377_v47 = vrot.slane %v2363_v15, %v4509_v32  ;;  %v3180_v39 = vrot.slane %v3164_v36, %v4509_v32  ;;  %v3187_v14 = vrot.slane %v3165_v37, %v4509_v32  ;;  %v1162_v34 = vrot.slane %v4591_v31, %v4489_v22 }
 0x16e   : > { %v3194_v51 = vrot.slane %v3166_v46, %v4509_v32  ;;  %v1166_v35 = vrot.slane %v4591_v31, %v4492_v23  ;;  %v1170_v41 = vrot.slane %v4591_v31, %v4495_v24  ;;  %v1174_v43 = vrot.slane %v4591_v31, %v4498_v25 }
 0x16f   : > { %v2378_v45 = vcombine.low %v2370_v38, %v2377_v47  ;;  %v3195_v56 = vcombine.low %v3173_v59, %v3180_v39  ;;  %v1178_v57 = vrot.slane %v4591_v31, %v4501_v27  ;;  %v1182_v61 = vrot.slane %v4591_v31, %v4504_v28 }
 0x170   : > { %v3196_v58 = vcombine.low %v3187_v14, %v3194_v51  ;;  %v2379_v62 = vcombine.low %v1154_v40, %v1158_v42  ;;  %v2380_v63 = vcombine.low %v1162_v34, %v1166_v35  ;;  %v2381_v4 = vcombine.low %v1170_v41, %v1174_v43 }
 0x171   : > { %3393 = vperm.xlu1 %3920, %v2378_v45   ;;  %v3203_v49 = vrot.slane %v3195_v56, %v4509_v32  ;;  %v1698_v6 = vrot.slane %v4920_v48, %v4205_v2  ;;  %v1702_v9 = vrot.slane %v4920_v48, %v4208_v3  ;;  %v2382_v26 = vcombine.low %v1178_v57, %v1182_v61 }
 0x172   : > { %v3210_v13 = vrot.slane %v3196_v58, %v4509_v32  ;;  %v2389_v29 = vrot.slane %v2379_v62, %v4509_v32  ;;  %v2396_v8 = vrot.slane %v2380_v63, %v4509_v32  ;;  %v2403_v31 = vrot.slane %v2381_v4, %v4509_v32 }
 0x173   : > { %v1706_v50 = vrot.slane %v4920_v48, %v4489_v22  ;;  %v1710_v10 = vrot.slane %v4920_v48, %v4492_v23  ;;  %v1714_v11 = vrot.slane %v4920_v48, %v4495_v24  ;;  %v2410_v12 = vrot.slane %v2382_v26, %v4509_v32 }
 0x174   : > { %v3211_v5 = vcombine.low %v3203_v49, %v3210_v13  ;;  %v2411_v44 = vcombine.low %v2389_v29, %v2396_v8  ;;  %v1718_v16 = vrot.slane %v4920_v48, %v4498_v25  ;;  %v1722_v7 = vrot.slane %v4920_v48, %v4501_v27 }
 0x175   : > { %v1726_v17 = vrot.slane %v4920_v48, %v4504_v28  ;;  %v3212_v19 = vcombine.low %v1698_v6, %v1702_v9  ;;  %v3213_v20 = vcombine.low %v1706_v50, %v1710_v10  ;;  %v2412_v21 = vcombine.low %v2403_v31, %v2410_v12 }
 0x176   : > { %3444 = vperm.xlu0 %3919, %v3211_v5   ;;  %v2419_v33 = vrot.slane %v2411_v44, %v4509_v32  ;;  %v3214_v18 = vcombine.low %v1714_v11, %v1718_v16  ;;  %v1186_v15 = vrot.slane %v4589_v30, %v4205_v2  ;;  %v1190_v38 = vrot.slane %v4589_v30, %v4208_v3 }
 0x177   : > { %v3215_v60 = vcombine.low %v1722_v7, %v1726_v17  ;;  %v3222_v36 = vrot.slane %v3212_v19, %v4509_v32  ;;  %v3229_v37 = vrot.slane %v3213_v20, %v4509_v32  ;;  %v2426_v48 = vrot.slane %v2412_v21, %v4509_v32 }
 0x178   : > { %v3236_v46 = vrot.slane %v3214_v18, %v4509_v32  ;;  %v1194_v40 = vrot.slane %v4589_v30, %v4489_v22  ;;  %v1198_v42 = vrot.slane %v4589_v30, %v4492_v23  ;;  %v1202_v39 = vrot.slane %v4589_v30, %v4495_v24 }
 0x179   : > { %v3243_v47 = vrot.slane %v3215_v60, %v4509_v32  ;;  %v3244_v59 = vcombine.low %v3222_v36, %v3229_v37  ;;  %v1206_v14 = vrot.slane %v4589_v30, %v4498_v25  ;;  %v2427_v51 = vcombine.low %v2419_v33, %v2426_v48 }
 0x17a   : > { %v1210_v34 = vrot.slane %v4589_v30, %v4501_v27  ;;  %v1214_v35 = vrot.slane %v4589_v30, %v4504_v28  ;;  %v2428_v41 = vcombine.low %v1186_v15, %v1190_v38  ;;  %v2429_v43 = vcombine.low %v1194_v40, %v1198_v42 }
 0x17b   : > { %v3245_v45 = vcombine.low %v3236_v46, %v3243_v47  ;;  %v3252_v56 = vrot.slane %v3244_v59, %v4509_v32  ;;  %v2430_v57 = vcombine.low %v1202_v39, %v1206_v14  ;;  %3396 = vperm.xlu1 %3920, %v2427_v51   ;;  %v1730_v62 = vrot.slane %v4966_v52, %v4205_v2 }
 0x17c   : > { %v2431_v58 = vcombine.low %v1210_v34, %v1214_v35  ;;  %v2438_v61 = vrot.slane %v2428_v41, %v4509_v32  ;;  %v1734_v63 = vrot.slane %v4966_v52, %v4208_v3  ;;  %v2445_v30 = vrot.slane %v2429_v43, %v4509_v32 }
 0x17d   : > { %v3259_v49 = vrot.slane %v3245_v45, %v4509_v32  ;;  %v2452_v4 = vrot.slane %v2430_v57, %v4509_v32  ;;  %v1738_v6 = vrot.slane %v4966_v52, %v4489_v22  ;;  %v1742_v13 = vrot.slane %v4966_v52, %v4492_v23 }
 0x17e   : > { %v2459_v9 = vrot.slane %v2431_v58, %v4509_v32  ;;  %v1746_v26 = vrot.slane %v4966_v52, %v4495_v24  ;;  %v1750_v29 = vrot.slane %v4966_v52, %v4498_v25  ;;  %v2460_v31 = vcombine.low %v2438_v61, %v2445_v30 }
 0x17f   : > { %v3260_v8 = vcombine.low %v3252_v56, %v3259_v49  ;;  %v1754_v50 = vrot.slane %v4966_v52, %v4501_v27  ;;  %v1758_v10 = vrot.slane %v4966_v52, %v4504_v28  ;;  %v3261_v5 = vcombine.low %v1730_v62, %v1734_v63 }
 0x180   : > { %v2461_v11 = vcombine.low %v2452_v4, %v2459_v9  ;;  %v3262_v12 = vcombine.low %v1738_v6, %v1742_v13  ;;  %v3263_v44 = vcombine.low %v1746_v26, %v1750_v29  ;;  %v2468_v16 = vrot.slane %v2460_v31, %v4509_v32 }
 0x181   : > { %3447 = vperm.xlu0 %3919, %v3260_v8   ;;  %v3264_v7 = vcombine.low %v1754_v50, %v1758_v10  ;;  %v1218_v17 = vrot.slane %v4605_v54, %v4205_v2  ;;  %v1222_v19 = vrot.slane %v4605_v54, %v4208_v3  ;;  %v3271_v21 = vrot.slane %v3261_v5, %v4509_v32 }
 0x182   : > { %v2475_v20 = vrot.slane %v2461_v11, %v4509_v32  ;;  %v3278_v52 = vrot.slane %v3262_v12, %v4509_v32  ;;  %v3285_v33 = vrot.slane %v3263_v44, %v4509_v32  ;;  %v1226_v15 = vrot.slane %v4605_v54, %v4489_v22 }
 0x183   : > { %v3292_v18 = vrot.slane %v3264_v7, %v4509_v32  ;;  %v1230_v60 = vrot.slane %v4605_v54, %v4492_v23  ;;  %v1234_v36 = vrot.slane %v4605_v54, %v4495_v24  ;;  %v1238_v48 = vrot.slane %v4605_v54, %v4498_v25 }
 0x184   : > { %v2476_v37 = vcombine.low %v2468_v16, %v2475_v20  ;;  %v3293_v38 = vcombine.low %v3271_v21, %v3278_v52  ;;  %v1242_v46 = vrot.slane %v4605_v54, %v4501_v27  ;;  %v1246_v42 = vrot.slane %v4605_v54, %v4504_v28 }
 0x185   : > { %v3294_v40 = vcombine.low %v3285_v33, %v3292_v18  ;;  %v2477_v47 = vcombine.low %v1218_v17, %v1222_v19  ;;  %v2478_v59 = vcombine.low %v1226_v15, %v1230_v60  ;;  %v2479_v14 = vcombine.low %v1234_v36, %v1238_v48 }
 0x186   : > { %3399 = vperm.xlu1 %3920, %v2476_v37   ;;  %v3301_v39 = vrot.slane %v3293_v38, %v4509_v32  ;;  %v1762_v51 = vrot.slane %v5012_v55, %v4205_v2  ;;  %v1766_v34 = vrot.slane %v5012_v55, %v4208_v3  ;;  %v2480_v41 = vcombine.low %v1242_v46, %v1246_v42 }
 0x187   : > { %v3308_v35 = vrot.slane %v3294_v40, %v4509_v32  ;;  %v2487_v45 = vrot.slane %v2477_v47, %v4509_v32  ;;  %v2494_v56 = vrot.slane %v2478_v59, %v4509_v32  ;;  %v2501_v54 = vrot.slane %v2479_v14, %v4509_v32 }
 0x188   : > { %v1770_v43 = vrot.slane %v5012_v55, %v4489_v22  ;;  %v1774_v57 = vrot.slane %v5012_v55, %v4492_v23  ;;  %v1778_v58 = vrot.slane %v5012_v55, %v4495_v24  ;;  %v2508_v62 = vrot.slane %v2480_v41, %v4509_v32 }
 0x189   : > { %v3309_v61 = vcombine.low %v3301_v39, %v3308_v35  ;;  %v2509_v63 = vcombine.low %v2487_v45, %v2494_v56  ;;  %v1782_v49 = vrot.slane %v5012_v55, %v4498_v25  ;;  %v1786_v30 = vrot.slane %v5012_v55, %v4501_v27 }
 0x18a   : > { %v1790_v4 = vrot.slane %v5012_v55, %v4504_v28  ;;  %v3310_v6 = vcombine.low %v1762_v51, %v1766_v34  ;;  %v3311_v9 = vcombine.low %v1770_v43, %v1774_v57  ;;  %v2510_v13 = vcombine.low %v2501_v54, %v2508_v62 }
 0x18b   : > { %3450 = vperm.xlu0 %3919, %v3309_v61   ;;  %v2517_v26 = vrot.slane %v2509_v63, %v4509_v32  ;;  %v3312_v29 = vcombine.low %v1778_v58, %v1782_v49  ;;  %v1250_v8 = vrot.slane %v4603_v53, %v4205_v2  ;;  %v1254_v11 = vrot.slane %v4603_v53, %v4208_v3 }
 0x18c   : > { %v3313_v31 = vcombine.low %v1786_v30, %v1790_v4  ;;  %v3320_v50 = vrot.slane %v3310_v6, %v4509_v32  ;;  %v3327_v10 = vrot.slane %v3311_v9, %v4509_v32  ;;  %v2524_v55 = vrot.slane %v2510_v13, %v4509_v32 }
 0x18d   : > { %v3334_v5 = vrot.slane %v3312_v29, %v4509_v32  ;;  %v1258_v12 = vrot.slane %v4603_v53, %v4489_v22  ;;  %v1262_v44 = vrot.slane %v4603_v53, %v4492_v23  ;;  %v1266_v7 = vrot.slane %v4603_v53, %v4495_v24 }
 0x18e   : > { %v3341_v2 = vrot.slane %v3313_v31, %v4509_v32  ;;  %v3342_v16 = vcombine.low %v3320_v50, %v3327_v10  ;;  %v1270_v17 = vrot.slane %v4603_v53, %v4498_v25  ;;  %v2525_v3 = vcombine.low %v2517_v26, %v2524_v55 }
 0x18f   : > { %v1274_v19 = vrot.slane %v4603_v53, %v4501_v27  ;;  %v1278_v20 = vrot.slane %v4603_v53, %v4504_v28  ;;  %v2526_v22 = vcombine.low %v1250_v8, %v1254_v11  ;;  %v2527_v52 = vcombine.low %v1258_v12, %v1262_v44 }
 0x190   : > { %v3343_v21 = vcombine.low %v3334_v5, %v3341_v2  ;;  %v3350_v23 = vrot.slane %v3342_v16, %v4509_v32  ;;  %v2528_v33 = vcombine.low %v1266_v7, %v1270_v17  ;;  %3402 = vperm.xlu1 %3920, %v2525_v3  }
 0x191   : > { %v2529_v18 = vcombine.low %v1274_v19, %v1278_v20  ;;  %v2536_v24 = vrot.slane %v2526_v22, %v4509_v32  ;;  %v2543_v27 = vrot.slane %v2527_v52, %v4509_v32 }
 0x192   : > { %v3357_v25 = vrot.slane %v3343_v21, %v4509_v32  ;;  %v2550_v15 = vrot.slane %v2528_v33, %v4509_v32 }
 0x193   : > { %v2557_v28 = vrot.slane %v2529_v18, %v4509_v32  ;;  %v2558_v60 = vcombine.low %v2536_v24, %v2543_v27 }
 0x194   : > { %v3358_v53 = vcombine.low %v3350_v23, %v3357_v25 }
 0x195   : > { %v2559_v36 = vcombine.low %v2550_v15, %v2557_v28  ;;  %v2566_v37 = vrot.slane %v2558_v60, %v4509_v32 }
 0x196   : > { %3453 = vperm.xlu0 %3919, %v3358_v53  }
 0x197   : > { %v2573_v38 = vrot.slane %v2559_v36, %v4509_v32 }
 0x199   : > { %v2574_v48 = vcombine.low %v2566_v37, %v2573_v38 }
 0x19b   : > { %3405 = vperm.xlu1 %3920, %v2574_v48  }
 0x19c   : > { %3964 = shalt.err (!%p3961_p2)
}
 0x19d   : > { %s3965_s22 = scalar_lea.hbm %s5261_s30, 8192  ;;  %s3969_s10 = scalar_lea.hbm %s5457_s3, 16384 }
 0x19e   : > { %p3966_p4 = scmp.ne.s32.totalorder %s5261_s30, %s3965_s22  ;;  %p3970_p9 = scmp.lt.u32.totalorder %s5261_s30, %s5457_s3 }
 0x19f   : > { %p3971_p1 = scmp.lt.u32.totalorder %s3969_s10, %s3965_s22  ;;  %p3973_p6 = scmp.lt.u32.totalorder %s3965_s22, %s5261_s30 }
 0x1a0   : > { %p3967_p5 = pnand %p3966_p4, %p5465_p11 }
 0x1a1   : > { %p3972_p3 = por %p3971_p1, %p3970_p9 }
 0x1a2   : > { %p3968_p7 = pneg %p3967_p5 }
 0x1a3   : > { %p3974_p12 = por %p3973_p6, %p3972_p3 }
 0x1a5   : > { %p3975_p13 = pnand %p3974_p12, %p3968_p7 }
 0x1a7   : > { %3978 = shalt.err (!%p3975_p13)
}
 0x1a8   : > { %s4057_s23 = smov 256   ;;  %s4058_s25 = smov 16   ;;  %v5290_v46 = vpop.permute.xlu1 %3363  ;;  %v3361_v14 = vpop.permute.xlu0 %3360  ;;  %v5315_v49 = vand.u32 127, %v297_v0  ;;  %vm3466_vm0 = vcmask 130112   ;;  %vm3473_vm1 = vcmask 195712   ;;  %vm3480_vm2 = vcmask 261312  }
 0x1a9   : > { %3864 = dma.vmem_to_hbm [thread:$0]  (%p5465_p11), %s5264_s5, 8192, %s5261_s30, %s3667_s6, %s4057_s23, %s4057_s23, %s4058_s25   ;;  %vm3487_vm3 = vcmask 326912   ;;  %vm3494_vm4 = vcmask 392512   ;;  %vm3501_vm5 = vcmask 458112   ;;  %vm3508_vm6 = vcmask 523712  }
 0x1aa   : > { %v3468_v4 = vadd.s32 4294967280, %v5315_v49  ;;  %v3461_v6 = vadd.s32 4294967288, %v5315_v49  ;;  %v3459_v13 = vsub.s32 %v5315_v49, %v4202_v1  ;;  %v3482_v29 = vadd.s32 4294967264, %v5315_v49  ;;  %s3815_s29 = sshll.u32 %s4189_s13, 1  ;;  %s3861_s30 = sshll.u32 %s4106_s19, 5 }
 0x1ab   : > { %v3475_v50 = vadd.s32 4294967272, %v5315_v49  ;;  %v3496_v12 = vadd.s32 4294967248, %v5315_v49  ;;  %v3489_v16 = vadd.s32 4294967256, %v5315_v49  ;;  %v3510_v23 = vadd.s32 4294967232, %v5315_v49  ;;  %s227_s5 = scalar_lea.vmem [#allocation6], %s3815_s29  ;;  %s5410_s14 = scalar_lea.hbm %s5458_s4, %s3861_s30 }
 0x1ac   : > { %v5292_v40 = vpop.permute.xlu1 %3366  ;;  %v5304_v34 = vpop.permute.xlu0 %3387  ;;  %v3471_v26 = vsub.s32 %v3468_v4, %v4202_v1  ;;  %v3464_v31 = vsub.s32 %v3461_v6, %v4202_v1  ;;  %v3485_v5 = vsub.s32 %v3482_v29, %v4202_v1  ;;  %v3503_v18 = vadd.s32 4294967240, %v5315_v49  ;;  %s3703_s6 = sshll.u32 %s227_s5, 4  ;;  %s3672_s19 = scalar_lea.sflag [#allocation7], %s4189_s13  ;;  %s5412_s6 = int_to_ptr.vmem [resolvable:$true] %s3703_s6 }
 0x1ad   : > { %v3478_v2 = vsub.s32 %v3475_v50, %v4202_v1  ;;  %v3499_v21 = vsub.s32 %v3496_v12, %v4202_v1  ;;  %v3492_v33 = vsub.s32 %v3489_v16, %v4202_v1  ;;  %v3460_v25 = vrot.slane %v3361_v14, %v3459_v13  ;;  %s3979_s20 = scalar_lea.vmem %s5412_s6, 32  ;;  %s4059_s22 = smov [#allocation6]  }
 0x1ae   : > { %v3465_v22 = vrot.slane %v5290_v46, %v3464_v31  ;;  %v3472_v52 = vrot.slane %v5292_v40, %v3471_v26  ;;  %v3517_v27 = vadd.s32 4294967224, %v5315_v49  ;;  %v3513_v48 = vsub.s32 %v3510_v23, %v4202_v1  ;;  %p3980_p8 = scmp.ne.s32.totalorder %s5412_s6, %s3979_s20  ;;  %s3983_s26 = sshll.u32 %s4059_s22, 4  ;;  %s3984_s26 = int_to_ptr.vmem [resolvable:$false] %s3983_s26 }
 0x1af   : > { %v3506_v14 = vsub.s32 %v3503_v18, %v4202_v1  ;;  %vm3515_vm7 = vcmask 589312   ;;  %vm3522_vm8 = vcmask 654912   ;;  %vm3529_vm9 = vcmask 720512   ;;  %s3985_s8 = scalar_lea.vmem %s3984_s26, 64  ;;  %p3986_p2 = scmp.lt.s32.totalorder %s5412_s6, %s3984_s26 }
 0x1b0   : > { %v5294_v42 = vpop.permute.xlu1 %3369  ;;  %v3412_v41 = vpop.permute.xlu0 %3411  ;;  %v3467_v37 = vsel %vm3466_vm0, %v3465_v22, %v3460_v25  ;;  %vm3536_vm10 = vcmask 786112   ;;  %vm3543_vm11 = vcmask 851712   ;;  %vm3550_vm12 = vcmask 917312   ;;  %p3981_p10 = pnand %p3980_p8, %p5465_p11  ;;  %p3987_p4 = scmp.lt.s32.totalorder %s3985_s8, %s3979_s20 }
 0x1b1   : > { %v3573_v55 = vrot.slane %v3412_v41, %v3464_v31  ;;  %v3479_v60 = vrot.slane %v5294_v42, %v3478_v2  ;;  %v3474_v40 = vsel %vm3473_vm1, %v3472_v52, %v3467_v37  ;;  %v3545_v31 = vadd.s32 4294967192, %v5315_v49 }
 0x1b2   : > { %vm3557_vm13 = vcmask 982912   ;;  %vm3564_vm14 = vcmask 1048512   ;;  %vm3663_vm15 = vcmp.lt.s32.totalorder %v297_v0, 256  ;;  %p3982_p0 = pneg %p3981_p10  ;;  %p3988_p5 = por %p3987_p4, %p3986_p2 }
 0x1b4   : > { %v5296_v47 = vpop.permute.xlu1 %3372  ;;  %v3418_v56 = vpop.permute.xlu0 %3417  ;;  %p3989_p7 = pnand %p3988_p5, %p3982_p0 }
 0x1b5   : > { %v3583_v20 = vrot.slane %v3418_v56, %v3478_v2  ;;  %v3486_v38 = vrot.slane %v5296_v47, %v3485_v5  ;;  %v3524_v47 = vadd.s32 4294967216, %v5315_v49 }
 0x1b7   : > { %v3527_v50 = vsub.s32 %v3524_v47, %v4202_v1 }
 0x1b8   : > { %v5298_v59 = vpop.permute.xlu1 %3375 }
 0x1b9   : > { %v3424_v43 = vpop.permute.xlu0 %3423 }
 0x1ba   : > { %v3593_v36 = vrot.slane %v3424_v43, %v3492_v33  ;;  %v3493_v43 = vrot.slane %v5298_v59, %v3492_v33 }
 0x1bc   : > { %v5300_v39 = vpop.permute.xlu1 %3378 }
 0x1bd   : > { %v3500_v6 = vrot.slane %v5300_v39, %v3499_v21 }
 0x1c0   : > { %v5302_v51 = vpop.permute.xlu1 %3381 }
 0x1c4   : > { %v5306_v35 = vpop.permute.xlu1 %3384  ;;  %v5308_v58 = vpop.permute.xlu0 %3429 }
 0x1c5   : > { %v3514_v59 = vrot.slane %v5306_v35, %v3513_v48 }
 0x1c8   : > { %v3409_v45 = vpop.permute.xlu1 %3408 }
 0x1c9   : > { %v3569_v10 = vrot.slane %v3409_v45, %v3459_v13  ;;  %v3520_v45 = vsub.s32 %v3517_v27, %v4202_v1  ;;  %v3538_v13 = vadd.s32 4294967200, %v5315_v49 }
 0x1cb   : > { %v3574_v7 = vsel %vm3466_vm0, %v3573_v55, %v3569_v10  ;;  %v3552_v10 = vadd.s32 4294967184, %v5315_v49  ;;  %v3541_v35 = vsub.s32 %v3538_v13, %v4202_v1  ;;  %v3521_v22 = vrot.slane %v5304_v34, %v3520_v45 }
 0x1cc   : > { %v3415_v54 = vpop.permute.xlu1 %3414 }
 0x1cd   : > { %v3578_v11 = vrot.slane %v3415_v54, %v3471_v26  ;;  %v3481_v54 = vsel %vm3480_vm2, %v3479_v60, %v3474_v40 }
 0x1ce   : > { %v3488_v4 = vsel %vm3487_vm3, %v3486_v38, %v3481_v54 }
 0x1cf   : > { %v5310_v62 = vpop.permute.xlu0 %3435  ;;  %v3579_v17 = vsel %vm3473_vm1, %v3578_v11, %v3574_v7  ;;  %v3495_v11 = vsel %vm3494_vm4, %v3493_v43, %v3488_v4  ;;  %v3548_v7 = vsub.s32 %v3545_v31, %v4202_v1 }
 0x1d0   : > { %v3421_v57 = vpop.permute.xlu1 %3420  ;;  %v3584_v24 = vsel %vm3480_vm2, %v3583_v20, %v3579_v17  ;;  %v3613_v55 = vrot.slane %v5310_v62, %v3520_v45  ;;  %v3502_v12 = vsel %vm3501_vm5, %v3500_v6, %v3495_v11 }
 0x1d1   : > { %v3588_v3 = vrot.slane %v3421_v57, %v3485_v5  ;;  %v3603_v57 = vrot.slane %v5308_v58, %v3506_v14  ;;  %v3559_v5 = vadd.s32 4294967176, %v5315_v49 }
 0x1d3   : > { %v3589_v15 = vsel %vm3487_vm3, %v3588_v3, %v3584_v24  ;;  %v3562_v52 = vsub.s32 %v3559_v5, %v4202_v1 }
 0x1d4   : > { %v3594_v41 = vsel %vm3494_vm4, %v3593_v36, %v3589_v15 }
 0x1d5   : > { %v3427_v61 = vpop.permute.xlu1 %3426 }
 0x1d6   : > { %v3598_v28 = vrot.slane %v3427_v61, %v3499_v21  ;;  %v3531_v61 = vadd.s32 4294967208, %v5315_v49  ;;  %v3555_v49 = vsub.s32 %v3552_v10, %v4202_v1 }
 0x1d8   : > { %v3599_v42 = vsel %vm3501_vm5, %v3598_v28, %v3594_v41 }
 0x1d9   : > { %v3604_v29 = vsel %vm3508_vm6, %v3603_v57, %v3599_v42 }
 0x1da   : > { %v5312_v63 = vpop.permute.xlu1 %3432 }
 0x1db   : > { %v3608_v56 = vrot.slane %v5312_v63, %v3513_v48  ;;  %v3507_v63 = vrot.slane %v5302_v51, %v3506_v14  ;;  %v3534_v51 = vsub.s32 %v3531_v61, %v4202_v1 }
 0x1dd   : > { %v3609_v58 = vsel %vm3515_vm7, %v3608_v56, %v3604_v29  ;;  %v3509_v2 = vsel %vm3508_vm6, %v3507_v63, %v3502_v12 }
 0x1de   : > { %v3614_v16 = vsel %vm3522_vm8, %v3613_v55, %v3609_v58  ;;  %v3516_v17 = vsel %vm3515_vm7, %v3514_v59, %v3509_v2 }
 0x1df   : > { %v3523_v24 = vsel %vm3522_vm8, %v3521_v22, %v3516_v17 }
 0x1e0   : > { %v5317_v30 = vpop.permute.xlu0 %3438 }
 0x1e1   : > { %v3618_v62 = vrot.slane %v5317_v30, %v3527_v50 }
 0x1e3   : > { %v3619_v33 = vsel %vm3529_vm9, %v3618_v62, %v3614_v16 }
 0x1e5   : > { %v5321_v9 = vpop.permute.xlu1 %3390 }
 0x1e6   : > { %v3528_v3 = vrot.slane %v5321_v9, %v3527_v50 }
 0x1eb   : > { %v5327_v8 = vpop.permute.xlu0 %3441 }
 0x1ec   : > { %v3623_v21 = vrot.slane %v5327_v8, %v3534_v51  ;;  %v3530_v8 = vsel %vm3529_vm9, %v3528_v3, %v3523_v24 }
 0x1ee   : > { %v3624_v27 = vsel %vm3536_vm10, %v3623_v21, %v3619_v33 }
 0x1f0   : > { %v5333_v44 = vpop.permute.xlu1 %3393 }
 0x1f1   : > { %v3535_v23 = vrot.slane %v5333_v44, %v3534_v51 }
 0x1f3   : > { %v3537_v15 = vsel %vm3536_vm10, %v3535_v23, %v3530_v8 }
 0x1f5   : > { %v5339_v19 = vpop.permute.xlu0 %3444 }
 0x1f6   : > { %v3628_v18 = vrot.slane %v5339_v19, %v3541_v35 }
 0x1f8   : > { %v3629_v19 = vsel %vm3543_vm11, %v3628_v18, %v3624_v27 }
 0x1fa   : > { %v5350_v53 = vpop.permute.xlu1 %3396 }
 0x1fb   : > { %v3542_v30 = vrot.slane %v5350_v53, %v3541_v35 }
 0x1fd   : > { %v3544_v53 = vsel %vm3543_vm11, %v3542_v30, %v3537_v15 }
 0x200   : > { %v5356_v46 = vpop.permute.xlu0 %3447 }
 0x201   : > { %v3633_v34 = vrot.slane %v5356_v46, %v3548_v7 }
 0x203   : > { %v3634_v36 = vsel %vm3550_vm12, %v3633_v34, %v3629_v19 }
 0x205   : > { %v3400_v26 = vpop.permute.xlu1 %3399 }
 0x206   : > { %v3549_v25 = vrot.slane %v3400_v26, %v3548_v7 }
 0x208   : > { %v3551_v37 = vsel %vm3550_vm12, %v3549_v25, %v3544_v53 }
 0x20a   : > { %v3451_v39 = vpop.permute.xlu0 %3450 }
 0x20b   : > { %v3638_v44 = vrot.slane %v3451_v39, %v3555_v49 }
 0x20d   : > { %v3639_v48 = vsel %vm3557_vm13, %v3638_v44, %v3634_v36 }
 0x20f   : > { %v3403_v20 = vpop.permute.xlu1 %3402 }
 0x210   : > { %v3556_v1 = vrot.slane %v3403_v20, %v3555_v49 }
 0x212   : > { %v3558_v46 = vsel %vm3557_vm13, %v3556_v1, %v3551_v37 }
 0x215   : > { %v3454_v9 = vpop.permute.xlu0 %3453 }
 0x216   : > { %v3643_v28 = vrot.slane %v3454_v9, %v3562_v52 }
 0x218   : > { %v3644_v40 = vsel %vm3564_vm14, %v3643_v28, %v3639_v48 }
 0x21a   : > { %v3406_v60 = vpop.permute.xlu1 %3405 }
 0x21b   : > { %v3563_v38 = vrot.slane %v3406_v60, %v3562_v52 }
 0x21d   : > { %v3565_v14 = vsel %vm3564_vm14, %v3563_v38, %v3558_v46 }
 0x21e   : > { %v3645_v41 = vcombine.low %v3565_v14, %v3644_v40 }
 0x220   : > { %v3652_v45 = vrot.slane %v3645_v41, %v4509_v32 }
 0x222   : > { %v3659_v42 = vrot.slane %v3652_v45, %v4509_v32 }
 0x224   : > { %3665 = vst.msk [vmem:[%s227_s5] sm:$0x3] %vm3663_vm15, %v3659_v42 }
 0x225   : > { %3992 = shalt.err (!%p3989_p7)
}
 0x226   : > { %s3993_s13 = scalar_lea.hbm %s5410_s14, 32  ;;  %s3997_s12 = scalar_lea.hbm %s5458_s4, 64 }
 0x227   : > { %p3994_p9 = scmp.ne.s32.totalorder %s5410_s14, %s3993_s13  ;;  %p3998_p6 = scmp.lt.u32.totalorder %s5410_s14, %s5458_s4 }
 0x228   : > { %p3999_p12 = scmp.lt.u32.totalorder %s3997_s12, %s3993_s13  ;;  %p4001_p8 = scmp.lt.u32.totalorder %s3993_s13, %s5410_s14 }
 0x229   : > { %p3995_p1 = pnand %p3994_p9, %p5465_p11 }
 0x22a   : > { %p4000_p13 = por %p3999_p12, %p3998_p6 }
 0x22b   : > { %p3996_p3 = pneg %p3995_p1 }
 0x22c   : > { %p4002_p10 = por %p4001_p8, %p4000_p13 }
 0x22e   : > { %p4003_p0 = pnand %p4002_p10, %p3996_p3 }
 0x230   : > { %4006 = shalt.err (!%p4003_p0)
}
 0x231   : > { %3865 = dma.vmem_to_hbm [thread:$0]  (%p5465_p11), %s5412_s6, 32, %s5410_s14, %s3672_s19  }
 0x232 PF: > { %s3715_s29 = sand.u32 1, %s4037_s15   ;;  %p5466_p2 = scmp.ne.s32.totalorder %s5463_s28, 0 }
 0x233   : > { %p5467_p4 = scmp.ge.s32.totalorder %s4049_s18, 2  ;;  %s3716_s30 = scalar_lea.sflag [#allocation4], %s3715_s29 }
 0x235   : > { %p3873_p5 = pnand %p5467_p4, %p5466_p2 }
 0x237   : > { %4028 = dma.done.wait (!%p3873_p5), %s3716_s30, 8192  }
 0x238   : > { %4030 = vsyncadd (!%p3873_p5), %s3716_s30, 4294959104  ;;  %s3725_s5 = scalar_lea.sflag [#allocation7], %s3715_s29 }
 0x239   : > { %4032 = dma.done.wait (!%p3873_p5), %s3725_s5, 32  }
 0x23a   : > { %4034 = vsyncadd (!%p3873_p5), %s3725_s5, 4294967264  ;;  %p21_p11 = scmp.ge.s32.totalorder %s4110_s21, 4   ;;  %s5468_s15 = smov %s4041_s16 }
 0x23b   : > { %s5469_s16 = smov %s4045_s17  ;;  %s5470_s17 = smov %s4122_s24 }
 0x23c   : > { %s5471_s18 = smov %s4110_s21  ;;  %23 = sbr.rel (!%p21_p11) target bundleno = 7 (0x7), region = 94 }
 0x243   :  { %3730 = vsyncpa [#allocation3], 1 }
 0x244   :  { %3732 = vsyncpa [#allocation3 + $0x1], 1 }
 0x245   :  { %3733 = vsyncpa [#allocation4], 1 }
 0x246   :  { %3735 = vsyncpa [#allocation4 + $0x1], 1 }
 0x247   :  { %3736 = vsyncpa [#allocation7], 1 }
 0x248   :  { %3738 = vsyncpa [#allocation7 + $0x1], 1 }

</bundles_post_ra>
